<compile_context>
chip_gen: v7x
topology: tpu7x:2x2x1
jax: 0.10.0
libtpu: 0.0.40
codegen_flags: <defaults>
</compile_context>

<pallas_src>
import numpy as np
import jax
import jax.numpy as jnp
from jax.experimental import pallas as pl
from jax.experimental.pallas import tpu as pltpu


# ----------------------------------------------------------------------------
# Hardware / capability helpers (safe fallbacks everywhere)
# ----------------------------------------------------------------------------
_TPU_INFO_CACHE = None
_SINGLE_BUFFER = "unset"


def _tpu_generation_info():
    """(num_tensorcores_per_chip, per-core VMEM bytes), conservative fallbacks."""
    global _TPU_INFO_CACHE
    if _TPU_INFO_CACHE is not None:
        return _TPU_INFO_CACHE
    n_tc, vmem = 1, 64 << 20
    try:
        info = pltpu.get_tpu_info()
        v = getattr(info, "vmem_capacity_bytes", None)
        if v:
            vmem = int(v)
        for attr in ("num_tensorcores", "tensorcores_per_chip", "num_cores",
                     "core_count"):
            c = getattr(info, attr, None)
            if c:
                n_tc = int(c)
                break
    except Exception:
        pass
    try:
        kind = jax.devices()[0].device_kind.lower()
        if "v7" in kind:                       # v7x: 2 TCs / chip, 64 MiB VMEM per TC
            n_tc = max(n_tc, 2)
            vmem = min(vmem, 64 << 20)
    except Exception:
        pass
    _TPU_INFO_CACHE = (n_tc, vmem)
    return _TPU_INFO_CACHE


def _single_buffer_mode():
    """pl.Buffered(1) if this jax/Mosaic supports single-buffering grid-invariant
    inputs via BlockSpec(pipeline_mode=...); otherwise None (default buffering)."""
    global _SINGLE_BUFFER
    if _SINGLE_BUFFER != "unset":
        return _SINGLE_BUFFER
    mode = None
    try:
        try:
            buffered = pl.Buffered(1)
        except TypeError:
            buffered = pl.Buffered(buffer_count=1)

        def _probe(x_ref, o_ref):
            o_ref[...] = x_ref[...] + 1.0

        x = jnp.zeros((8, 128), jnp.float32)
        res = pl.pallas_call(
            _probe,
            out_shape=jax.ShapeDtypeStruct((16, 128), jnp.float32),
            grid=(2,),
            in_specs=[pl.BlockSpec((8, 128), lambda i: (0, 0),
                                   pipeline_mode=buffered)],
            out_specs=pl.BlockSpec((8, 128), lambda i: (i, 0)),
        )(x)
        jax.block_until_ready(res)
        mode = buffered
    except Exception:
        mode = None
    _SINGLE_BUFFER = mode
    return mode


def _weight_spec(block_shape, index_map):
    """BlockSpec for grid-invariant weights; single-buffered when supported."""
    mode = _single_buffer_mode()
    if mode is None:
        return pl.BlockSpec(block_shape, index_map)
    return pl.BlockSpec(block_shape, index_map, pipeline_mode=mode)


def _vmem_limit(needed_bytes, vmem_bytes):
    return int(max(32 << 20, min(vmem_bytes - (2 << 20), 2 * needed_bytes)))


def _gru_vmem_est(tb, K, D, H):
    io = 2 * (K * tb * D * 2 + K * tb * H * 4 + tb * H * 4)   # x/out/h0 double-buffered
    w = 3 * D * H * 2 + 3 * H * H * 2 + 2 * 3 * H * 4
    live = 8 * tb * H * 4                                      # per-step gate temps + h
    return io + w + live


def _pick_gru_tb(B, K, D, H, n_tc, vmem_bytes):
    budget = int(0.7 * vmem_bytes)
    tb = B
    # Split the batch across TensorCores only on multi-TC chips (v7x) and only
    # when each half still feeds the MXU with a large M dimension; on v5e/v6e
    # the grid is a serial loop so splitting only adds pipeline overhead.
    if n_tc >= 2 and B % 32 == 0 and B // 2 >= 256:
        tb = B // 2
    while (_gru_vmem_est(tb, K, D, H) > budget and tb % 2 == 0
           and (tb // 2) % 16 == 0 and B % (tb // 2) == 0):
        tb //= 2
    return tb


def _pred_vmem_est(tp, H):
    io = 2 * (2 * tp * H * 2 + tp * 4)        # preds + target tile (bf16) + mask, x2 buffers
    w = 3 * H * H * 2 + 6 * H * 4
    scratch = tp * H * 4
    live = 4 * tp * H * 4
    return io + w + scratch + live


def _pick_row_tile(P, H, vmem_bytes):
    """Balanced 16-aligned row tile (bf16 sublane packing) and padded row count."""
    budget = int(0.6 * vmem_bytes)
    tp_cap = 512
    while tp_cap > 128 and _pred_vmem_est(tp_cap, H) > budget:
        tp_cap //= 2
    n_blocks = max(1, -(-P // tp_cap))
    tp = -(-P // n_blocks)
    tp = max(16, ((tp + 15) // 16) * 16)
    return tp, n_blocks * tp


# ----------------------------------------------------------------------------
# Pallas kernel 1: GRU (PyTorch gate order r, z, n; per-gate weight layout)
# ----------------------------------------------------------------------------
def _gru_kernel(x_ref, h0_ref, wih_ref, whh_ref, bih_ref, bhh_ref, out_ref):
    # x: (K, TB, D) bf16, h0: (TB, H) f32, wih: (3, D, H) bf16, whh: (3, H, H) bf16,
    # bih/bhh: (3, 1, H) f32, out: (K, TB, H) f32.  Gate order: r, z, n.
    K = x_ref.shape[0]
    wih_r, wih_z, wih_n = wih_ref[0], wih_ref[1], wih_ref[2]
    whh_r, whh_z, whh_n = whh_ref[0], whh_ref[1], whh_ref[2]
    bih_r, bih_z, bih_n = bih_ref[0], bih_ref[1], bih_ref[2]
    bhh_r, bhh_z, bhh_n = bhh_ref[0], bhh_ref[1], bhh_ref[2]

    h = h0_ref[...]
    for k in range(K):   # statically unrolled; K = cpc_forward_steps (small)
        xk = x_ref[k]    # (TB, D), free leading-axis view
        # Input projection: h-independent, so the scheduler can overlap these
        # with the serial h@whh chain of the previous step.
        gi_r = jnp.dot(xk, wih_r, preferred_element_type=jnp.float32) + bih_r
        gi_z = jnp.dot(xk, wih_z, preferred_element_type=jnp.float32) + bih_z
        gi_n = jnp.dot(xk, wih_n, preferred_element_type=jnp.float32) + bih_n
        hb = h.astype(jnp.bfloat16)
        gh_r = jnp.dot(hb, whh_r, preferred_element_type=jnp.float32) + bhh_r
        gh_z = jnp.dot(hb, whh_z, preferred_element_type=jnp.float32) + bhh_z
        gh_n = jnp.dot(hb, whh_n, preferred_element_type=jnp.float32) + bhh_n
        r = jax.nn.sigmoid(gi_r + gh_r)
        z = jax.nn.sigmoid(gi_z + gh_z)
        n_gate = jnp.tanh(gi_n + r * gh_n)
        h = (1.0 - z) * n_gate + z * h
        out_ref[k] = h.astype(out_ref.dtype)


def gru_forward(x, h0, wih3, whh3, bih3, bhh3):
    """x: (K, B, D) time-major, h0: (B, H), wih3: (3, D, H), whh3: (3, H, H),
    bih3/bhh3: (3, 1, H).  Gate order along the leading axis: (r, z, n)."""
    K, B, D = x.shape
    H = h0.shape[-1]
    n_tc, vmem_bytes = _tpu_generation_info()
    TB = _pick_gru_tb(B, K, D, H, n_tc, vmem_bytes)
    vmem_limit = _vmem_limit(_gru_vmem_est(TB, K, D, H), vmem_bytes)

    return pl.pallas_call(
        _gru_kernel,
        out_shape=jax.ShapeDtypeStruct((K, B, H), jnp.float32),
        grid_spec=pltpu.PrefetchScalarGridSpec(
            num_scalar_prefetch=0,
            grid=(B // TB,),
            in_specs=[
                pl.BlockSpec((K, TB, D), lambda b: (0, b, 0)),
                pl.BlockSpec((TB, H), lambda b: (b, 0)),
                _weight_spec((3, D, H), lambda b: (0, 0, 0)),
                _weight_spec((3, H, H), lambda b: (0, 0, 0)),
                _weight_spec((3, 1, H), lambda b: (0, 0, 0)),
                _weight_spec((3, 1, H), lambda b: (0, 0, 0)),
            ],
            out_specs=pl.BlockSpec((K, TB, H), lambda b: (0, b, 0)),
        ),
        compiler_params=pltpu.CompilerParams(
            dimension_semantics=("parallel",),
            vmem_limit_bytes=vmem_limit),
    )(x.astype(jnp.bfloat16), h0,
      wih3.astype(jnp.bfloat16), whh3.astype(jnp.bfloat16), bih3, bhh3)


# ----------------------------------------------------------------------------
# Pallas kernel 2: predictor MLP + BCE-with-logits + masked reduction,
# fused over {positive, 20 negatives} on grid axis 1.
# ----------------------------------------------------------------------------
def _pred_loss_kernel(preds_ref, tgt_ref, mask_ref, w1t_ref, w1b_ref, b1_ref,
                      w2_ref, b2_ref, w3_ref, b3_ref, out_ref, pretop_sc):
    j = pl.program_id(1)  # 0 = positive targets, 1..NNEG = negative sets

    @pl.when(j == 0)
    def _():
        out_ref[...] = jnp.zeros_like(out_ref)
        # preds half of Linear(2H,H) with b1 folded in: computed once per row
        # tile, reused for the positive pass and all 20 negative passes.
        pretop_sc[...] = (jnp.dot(preds_ref[...], w1t_ref[...],
                                  preferred_element_type=jnp.float32)
                          + b1_ref[...])

    tgt = tgt_ref[0]                                                   # (TP, H) bf16
    h1 = jnp.maximum(
        pretop_sc[...]
        + jnp.dot(tgt, w1b_ref[...], preferred_element_type=jnp.float32), 0.0)
    h2 = jnp.maximum(
        jnp.dot(h1.astype(jnp.bfloat16), w2_ref[...],
                preferred_element_type=jnp.float32) + b2_ref[...], 0.0)
    # Final (H,1) projection as VPU multiply + lane reduction (MXU stays free).
    logit = jnp.sum(h2 * w3_ref[...], axis=-1, keepdims=True) + b3_ref[...]  # (TP,1)

    target = jnp.where(j == 0, 1.0, 0.0)
    # Numerically-stable BCE with logits: max(x,0) - x*t + log(1 + exp(-|x|)).
    # TODO(synk): pack the (TP,1) logits lane-dense before the exp/log chain if
    # profiling ever shows EUP pressure on v5e.
    loss = (jnp.maximum(logit, 0.0) - logit * target
            + jnp.log(1.0 + jnp.exp(-jnp.abs(logit))))
    contrib = jnp.sum(loss * mask_ref[...])          # masked partial sum (scalar)

    lane = jax.lax.broadcasted_iota(jnp.int32, out_ref.shape, 2)
    slot = jnp.where(j == 0, 0, 1)                   # lane 0: positive, lane 1: negative
    out_ref[...] += jnp.where(lane == slot, contrib, 0.0)


def predictor_losses(preds, targets_all, mask, w1, b1, w2, b2, w3, b3, tp):
    """preds: (Pp, H) f32 (already padded); targets_all: (NJ, Pp, H) bf16 with
    slot 0 = positive targets, slots 1.. = negative sets; mask: (Pp, 1) f32.
    Returns (masked positive loss sum, masked negative loss sum)."""
    NJ, Pp, H = targets_all.shape
    assert Pp % tp == 0
    n_row_blocks = Pp // tp
    _, vmem_bytes = _tpu_generation_info()
    vmem_limit = _vmem_limit(_pred_vmem_est(tp, H), vmem_bytes)

    w1_top, w1_bot = w1[:H], w1[H:]   # preds half / targets half of Linear(2H, H)

    # TODO(synk): on v5e, raise the target-stream BlockSpec to pl.Buffered(3) if
    # the per-j target DMA is exposed after the bf16 matmul speedup.
    # TODO(synk): when n*t*H fits VMEM, gather target rows in-kernel from a
    # resident rnn_inputs block instead of materializing (1+NNEG, P, H) in HBM.
    out = pl.pallas_call(
        _pred_loss_kernel,
        out_shape=jax.ShapeDtypeStruct((n_row_blocks, 1, 128), jnp.float32),
        grid_spec=pltpu.PrefetchScalarGridSpec(
            num_scalar_prefetch=0,
            grid=(n_row_blocks, NJ),
            in_specs=[
                pl.BlockSpec((tp, H), lambda i, j: (i, 0)),        # preds (per-i)
                pl.BlockSpec((1, tp, H), lambda i, j: (j, i, 0)),  # target sets
                pl.BlockSpec((tp, 1), lambda i, j: (i, 0)),        # mask (per-i)
                _weight_spec((H, H), lambda i, j: (0, 0)),         # W1[:H]
                _weight_spec((H, H), lambda i, j: (0, 0)),         # W1[H:]
                _weight_spec((1, H), lambda i, j: (0, 0)),         # b1
                _weight_spec((H, H), lambda i, j: (0, 0)),         # W2
                _weight_spec((1, H), lambda i, j: (0, 0)),         # b2
                _weight_spec((1, H), lambda i, j: (0, 0)),         # w3 row
                _weight_spec((1, 1), lambda i, j: (0, 0)),         # b3
            ],
            out_specs=pl.BlockSpec((1, 1, 128), lambda i, j: (i, 0, 0)),
            scratch_shapes=[pltpu.VMEM((tp, H), jnp.float32)],
        ),
        compiler_params=pltpu.CompilerParams(
            dimension_semantics=("parallel", "arbitrary"),
            vmem_limit_bytes=vmem_limit),
    )(preds.astype(jnp.bfloat16), targets_all, mask,
      w1_top.astype(jnp.bfloat16), w1_bot.astype(jnp.bfloat16),
      b1.reshape(1, H), w2.astype(jnp.bfloat16), b2.reshape(1, H),
      w3.reshape(1, H), b3.reshape(1, 1))
    return jnp.sum(out[:, 0, 0]), jnp.sum(out[:, 0, 1])


# ----------------------------------------------------------------------------
# CPCA forward (glue in plain JAX)
# ----------------------------------------------------------------------------
def build_unfolded(x, k):
    """torch: cat(x, zeros(n,k,d), 1).unfold(1, k, 1).permute(3,0,1,2)."""
    n, T, d = x.shape
    padded = jnp.concatenate([x, jnp.zeros((n, k, d), x.dtype)], axis=1)
    idx = jnp.arange(k)[:, None] + jnp.arange(T + 1)[None, :]   # (k, T+1)
    out = padded[:, idx, :]                                     # (n, k, T+1, d)
    return jnp.transpose(out, (1, 0, 2, 3))                     # (k, n, T+1, d)


def cpca_forward(cfg, params, actions, not_dones, valids, rnn_inputs, rnn_outputs, key):
    n, t, _ = actions.shape
    H = cfg["hidden_size"]
    K = cfg["cpc_forward_steps"]
    ts = cfg["cpc_time_subsample"]
    fs = cfg["cpc_forward_subsample"]
    NNEG = 20

    key_t, key_u, key_neg = jax.random.split(key, 3)

    # ----- mask construction + subsampling -----
    # TODO(synk): jax.random replaces torch RNG (different stream); the unroll
    # subsample is drawn from the static K instead of the data-dependent max_k,
    # which removes two device->host syncs; invalid steps are masked out anyway.
    valid_mask = ((not_dones > 0) & valids).astype(jnp.float32)       # (n, t, 1)
    vm_unf = build_unfolded(valid_mask[:, :-1], K)                    # (K, n, t, 1)
    time_subsample = jax.random.permutation(key_t, t - 1)[:ts]        # (ts,)
    fm = jnp.cumprod(vm_unf[:, :, time_subsample, :], axis=0)         # (K, n, ts, 1)
    unroll_subsample = jax.random.permutation(key_u, K)[:fs]          # (fs,)
    forward_mask = (fm[unroll_subsample] > 0).reshape(fs * n * ts)    # (P,)

    B = n * ts
    P = fs * B
    _, vmem_bytes = _tpu_generation_info()
    TP, Pp = _pick_row_tile(P, H, vmem_bytes)

    mask_f = jnp.pad(forward_mask.astype(jnp.float32).reshape(P, 1),
                     ((0, Pp - P), (0, 0)))                           # padded rows -> 0
    mask_sum = jnp.sum(mask_f)

    # ----- action embedding (single discrete action head) -----
    emb = params["action_embed"][actions[..., 0]]                     # (n, t, 32)

    # ----- GRU forward predictions (Pallas kernel 1) -----
    actions_unf = build_unfolded(emb[:, :-1], K)[:, :, time_subsample, :]
    x_rnn = actions_unf.reshape(K, B, -1)                             # (K, B, 32)
    h0 = rnn_outputs[:, :-1, :][:, time_subsample, :].reshape(B, H)
    preds_all = gru_forward(x_rnn, h0, params["wih"], params["whh"],
                            params["bih"], params["bhh"])             # (K, B, H)
    preds2d = preds_all[unroll_subsample].reshape(P, H)               # (fs*B, H)
    preds2d = jnp.pad(preds2d, ((0, Pp - P), (0, 0)))

    # ----- targets: ONE gather over rnn_inputs rows (positives + 20 negative
    # sets), built directly at the padded row count and in bf16 so the big
    # (1+NNEG, Pp, H) array is written/read exactly once at half width -----
    pos_time = jnp.minimum(
        1 + time_subsample[None, :] + unroll_subsample[:, None], t - 1)   # (fs, ts)
    # clamped (out-of-range) rows are exactly the rows with mask == 0
    pos_rows = (jnp.arange(n)[None, :, None] * t
                + pos_time[:, None, :]).reshape(P)                        # (P,)
    pos_rows = jnp.pad(pos_rows, (0, Pp - P))
    neg_rows = jax.random.randint(key_neg, (NNEG, Pp), 0, n * t)
    all_rows = jnp.concatenate([pos_rows[None], neg_rows], axis=0)        # (1+NNEG, Pp)
    targets_all = rnn_inputs.reshape(n * t, H).astype(jnp.bfloat16)[all_rows]

    # ----- fused predictor MLP + BCE + masked reduction (Pallas kernel 2) -----
    pos_sum, neg_sum = predictor_losses(
        preds2d, targets_all, mask_f,
        params["w1"], params["b1"], params["w2"], params["b2"],
        params["w3"], params["b3"], TP)

    positive_loss = pos_sum / mask_sum
    negative_loss = neg_sum / (NNEG * mask_sum)
    return 0.1 * (positive_loss + negative_loss)


# ----------------------------------------------------------------------------
# Deterministic parameter init + example run
# ----------------------------------------------------------------------------
def init_params(key, hidden, num_action_logits, embed_dim=32):
    ks = jax.random.split(key, 8)
    d_in = embed_dim  # num_actions = 1 -> GRU input = 32
    nrm = lambda k, s: (0.1 * jax.random.normal(k, s)).astype(jnp.float32)
    return {
        "action_embed": nrm(ks[0], (num_action_logits, embed_dim)),
        # GRU weights, per-gate layout, gate order (r, z, n)
        "wih": nrm(ks[1], (3, d_in, hidden)),
        "whh": nrm(ks[2], (3, hidden, hidden)),
        "bih": nrm(ks[3], (3, 1, hidden)),
        "bhh": nrm(ks[4], (3, 1, hidden)),
        # Predictor MLP: Linear(2H,H) -> ReLU -> Linear(H,H) -> ReLU -> Linear(H,1)
        "w1": nrm(ks[5], (2 * hidden, hidden)),
        "b1": jnp.zeros((hidden,), jnp.float32),
        "w2": nrm(ks[6], (hidden, hidden)),
        "b2": jnp.zeros((hidden,), jnp.float32),
        "w3": nrm(ks[7], (hidden, 1)),
        "b3": jnp.zeros((1,), jnp.float32),
    }


if __name__ == "__main__":
    cfg = {
        "cpc_forward_steps": 4,
        "cpc_time_subsample": 4,
        "cpc_forward_subsample": 2,
        "hidden_size": 32,
    }
    n, t = 4, 8
    num_action_logits = 5  # Discrete(5) -> num_actions = 1

    # Pre-warm hardware / capability probes (outside jit).
    _tpu_generation_info()
    _single_buffer_mode()

    root = jax.random.PRNGKey(0)
    kp, ka, ki, ko, kfwd = jax.random.split(root, 5)

    params = init_params(kp, cfg["hidden_size"], num_action_logits)

    actions = jax.random.randint(ka, (n, t, 1), 0, num_action_logits)
    not_dones = jnp.ones((n, t, 1), jnp.float32).at[0, 5, 0].set(0.0)
    valids = jnp.ones((n, t, 1), dtype=bool)
    rnn_inputs = jax.random.normal(ki, (n, t, cfg["hidden_size"]), jnp.float32)
    rnn_outputs = jax.random.normal(ko, (n, t, cfg["hidden_size"]), jnp.float32)

    # No host-side syncs inside the forward -> can be jitted end to end.
    fwd = jax.jit(lambda p, a, nd, v, ri, ro, k:
                  cpca_forward(cfg, p, a, nd, v, ri, ro, k))
    loss = fwd(params, actions, not_dones, valids, rnn_inputs, rnn_outputs, kfwd)
    loss = jax.block_until_ready(loss)
    assert np.isfinite(float(loss))
    print("KERNEL_OK")
</pallas_src>

<mosaic_0001>
module attributes {stable_mosaic.version = 11 : i64} {
  func.func @_probe(%arg0: i32, %arg1: memref<8x128xf32, #tpu.memory_space<vmem>>, %arg2: memref<8x128xf32, #tpu.memory_space<vmem>>) attributes {dimension_semantics = [#tpu.dimension_semantics<arbitrary>], iteration_bounds = array<i64: 2>, scalar_prefetch = 0 : i64, scratch_operands = 0 : i64, tpu.core_type = #tpu.core_type<tc>, window_params = [{pipeline_mode = #tpu.pipeline_mode<synchronous>, transform_indices = @transform_0, window_bounds = array<i64: 8, 128>}, {transform_indices = @transform_1, window_bounds = array<i64: 8, 128>}]} {
    %c0 = arith.constant 0 : index
    %c0_0 = arith.constant 0 : index
    %0 = vector.load %arg1[%c0, %c0_0] : memref<8x128xf32, #tpu.memory_space<vmem>>, vector<8x128xf32>
    %cst = arith.constant 1.000000e+00 : f32
    %1 = vector.broadcast %cst : f32 to vector<8x128xf32>
    %2 = arith.addf %0, %1 : vector<8x128xf32>
    %c0_1 = arith.constant 0 : index
    %c0_2 = arith.constant 0 : index
    %3 = vector.load %arg2[%c0_1, %c0_2] : memref<8x128xf32, #tpu.memory_space<vmem>>, vector<8x128xf32>
    tpu.vector_store %arg2[%c0_1, %c0_2], %2 {strides = array<i32>} : memref<8x128xf32, #tpu.memory_space<vmem>>, vector<8x128xf32>,
    return
  }
  func.func @transform_0(%arg0: i32) -> (i32, i32) {
    %c0_i32 = arith.constant 0 : i32
    %c0_i32_0 = arith.constant 0 : i32
    %c0_i32_1 = arith.constant 0 : i32
    return %c0_i32, %c0_i32_0 : i32, i32
  }
  func.func @transform_1(%arg0: i32) -> (i32, i32) {
    %c0_i32 = arith.constant 0 : i32
    %c0_i32_0 = arith.constant 0 : i32
    return %arg0, %c0_i32 : i32, i32
  }
}

module attributes {stable_mosaic.version = 11 : i64} {
  func.func @_gru_kernel(%arg0: i32, %arg1: memref<4x16x32xbf16, #tpu.memory_space<vmem>>, %arg2: memref<16x32xf32, #tpu.memory_space<vmem>>, %arg3: memref<3x32x32xbf16, #tpu.memory_space<vmem>>, %arg4: memref<3x32x32xbf16, #tpu.memory_space<vmem>>, %arg5: memref<3x1x32xf32, #tpu.memory_space<vmem>>, %arg6: memref<3x1x32xf32, #tpu.memory_space<vmem>>, %arg7: memref<4x16x32xf32, #tpu.memory_space<vmem>>) attributes {dimension_semantics = [#tpu.dimension_semantics<parallel>], iteration_bounds = array<i64: 1>, scalar_prefetch = 0 : i64, scratch_operands = 0 : i64, tpu.core_type = #tpu.core_type<tc>, window_params = [{transform_indices = @transform_0, window_bounds = array<i64: 4, 16, 32>}, {transform_indices = @transform_1, window_bounds = array<i64: 16, 32>}, {pipeline_mode = #tpu.pipeline_mode<synchronous>, transform_indices = @transform_2, window_bounds = array<i64: 3, 32, 32>}, {pipeline_mode = #tpu.pipeline_mode<synchronous>, transform_indices = @transform_3, window_bounds = array<i64: 3, 32, 32>}, {pipeline_mode = #tpu.pipeline_mode<synchronous>, transform_indices = @transform_4, window_bounds = array<i64: 3, 1, 32>}, {pipeline_mode = #tpu.pipeline_mode<synchronous>, transform_indices = @transform_5, window_bounds = array<i64: 3, 1, 32>}, {transform_indices = @transform_6, window_bounds = array<i64: 4, 16, 32>}]} {
    %c0 = arith.constant 0 : index
    %c0_0 = arith.constant 0 : index
    %c0_1 = arith.constant 0 : index
    %0 = vector.load %arg3[%c0, %c0_0, %c0_1] : memref<3x32x32xbf16, #tpu.memory_space<vmem>>, vector<1x32x32xbf16>
    %1 = vector.shape_cast %0 : vector<1x32x32xbf16> to vector<32x32xbf16>
    %c1 = arith.constant 1 : index
    %c0_2 = arith.constant 0 : index
    %c0_3 = arith.constant 0 : index
    %2 = vector.load %arg3[%c1, %c0_2, %c0_3] : memref<3x32x32xbf16, #tpu.memory_space<vmem>>, vector<1x32x32xbf16>
    %3 = vector.shape_cast %2 : vector<1x32x32xbf16> to vector<32x32xbf16>
    %c2 = arith.constant 2 : index
    %c0_4 = arith.constant 0 : index
    %c0_5 = arith.constant 0 : index
    %4 = vector.load %arg3[%c2, %c0_4, %c0_5] : memref<3x32x32xbf16, #tpu.memory_space<vmem>>, vector<1x32x32xbf16>
    %5 = vector.shape_cast %4 : vector<1x32x32xbf16> to vector<32x32xbf16>
    %c0_6 = arith.constant 0 : index
    %c0_7 = arith.constant 0 : index
    %c0_8 = arith.constant 0 : index
    %6 = vector.load %arg4[%c0_6, %c0_7, %c0_8] : memref<3x32x32xbf16, #tpu.memory_space<vmem>>, vector<1x32x32xbf16>
    %7 = vector.shape_cast %6 : vector<1x32x32xbf16> to vector<32x32xbf16>
    %c1_9 = arith.constant 1 : index
    %c0_10 = arith.constant 0 : index
    %c0_11 = arith.constant 0 : index
    %8 = vector.load %arg4[%c1_9, %c0_10, %c0_11] : memref<3x32x32xbf16, #tpu.memory_space<vmem>>, vector<1x32x32xbf16>
    %9 = vector.shape_cast %8 : vector<1x32x32xbf16> to vector<32x32xbf16>
    %c2_12 = arith.constant 2 : index
    %c0_13 = arith.constant 0 : index
    %c0_14 = arith.constant 0 : index
    %10 = vector.load %arg4[%c2_12, %c0_13, %c0_14] : memref<3x32x32xbf16, #tpu.memory_space<vmem>>, vector<1x32x32xbf16>
    %11 = vector.shape_cast %10 : vector<1x32x32xbf16> to vector<32x32xbf16>
    %c0_15 = arith.constant 0 : index
    %c0_16 = arith.constant 0 : index
    %c0_17 = arith.constant 0 : index
    %12 = vector.load %arg5[%c0_15, %c0_16, %c0_17] : memref<3x1x32xf32, #tpu.memory_space<vmem>>, vector<1x1x32xf32>
    %13 = vector.shape_cast %12 : vector<1x1x32xf32> to vector<1x32xf32>
    %c1_18 = arith.constant 1 : index
    %c0_19 = arith.constant 0 : index
    %c0_20 = arith.constant 0 : index
    %14 = vector.load %arg5[%c1_18, %c0_19, %c0_20] : memref<3x1x32xf32, #tpu.memory_space<vmem>>, vector<1x1x32xf32>
    %15 = vector.shape_cast %14 : vector<1x1x32xf32> to vector<1x32xf32>
    %c2_21 = arith.constant 2 : index
    %c0_22 = arith.constant 0 : index
    %c0_23 = arith.constant 0 : index
    %16 = vector.load %arg5[%c2_21, %c0_22, %c0_23] : memref<3x1x32xf32, #tpu.memory_space<vmem>>, vector<1x1x32xf32>
    %17 = vector.shape_cast %16 : vector<1x1x32xf32> to vector<1x32xf32>
    %c0_24 = arith.constant 0 : index
    %c0_25 = arith.constant 0 : index
    %c0_26 = arith.constant 0 : index
    %18 = vector.load %arg6[%c0_24, %c0_25, %c0_26] : memref<3x1x32xf32, #tpu.memory_space<vmem>>, vector<1x1x32xf32>
    %19 = vector.shape_cast %18 : vector<1x1x32xf32> to vector<1x32xf32>
    %c1_27 = arith.constant 1 : index
    %c0_28 = arith.constant 0 : index
    %c0_29 = arith.constant 0 : index
    %20 = vector.load %arg6[%c1_27, %c0_28, %c0_29] : memref<3x1x32xf32, #tpu.memory_space<vmem>>, vector<1x1x32xf32>
    %21 = vector.shape_cast %20 : vector<1x1x32xf32> to vector<1x32xf32>
    %c2_30 = arith.constant 2 : index
    %c0_31 = arith.constant 0 : index
    %c0_32 = arith.constant 0 : index
    %22 = vector.load %arg6[%c2_30, %c0_31, %c0_32] : memref<3x1x32xf32, #tpu.memory_space<vmem>>, vector<1x1x32xf32>
    %23 = vector.shape_cast %22 : vector<1x1x32xf32> to vector<1x32xf32>
    %c0_33 = arith.constant 0 : index
    %c0_34 = arith.constant 0 : index
    %24 = vector.load %arg2[%c0_33, %c0_34] : memref<16x32xf32, #tpu.memory_space<vmem>>, vector<16x32xf32>
    %c0_35 = arith.constant 0 : index
    %c0_36 = arith.constant 0 : index
    %c0_37 = arith.constant 0 : index
    %25 = vector.load %arg1[%c0_35, %c0_36, %c0_37] : memref<4x16x32xbf16, #tpu.memory_space<vmem>>, vector<1x16x32xbf16>
    %26 = vector.shape_cast %25 : vector<1x16x32xbf16> to vector<16x32xbf16>
    %cst = arith.constant dense<0.000000e+00> : vector<16x32xf32>
    %27 = tpu.matmul %26, %1, %cst {dimension_numbers = #tpu.dot_dimension_numbers<[1], [0], [0], [1], [0, 0, 1, 1], [], []>} : vector<16x32xbf16>, vector<32x32xbf16>, vector<16x32xf32> -> vector<16x32xf32>
    %28 = vector.broadcast %13 : vector<1x32xf32> to vector<16x32xf32>
    %29 = arith.addf %27, %28 : vector<16x32xf32>
    %cst_38 = arith.constant dense<0.000000e+00> : vector<16x32xf32>
    %30 = tpu.matmul %26, %3, %cst_38 {dimension_numbers = #tpu.dot_dimension_numbers<[1], [0], [0], [1], [0, 0, 1, 1], [], []>} : vector<16x32xbf16>, vector<32x32xbf16>, vector<16x32xf32> -> vector<16x32xf32>
    %31 = vector.broadcast %15 : vector<1x32xf32> to vector<16x32xf32>
    %32 = arith.addf %30, %31 : vector<16x32xf32>
    %cst_39 = arith.constant dense<0.000000e+00> : vector<16x32xf32>
    %33 = tpu.matmul %26, %5, %cst_39 {dimension_numbers = #tpu.dot_dimension_numbers<[1], [0], [0], [1], [0, 0, 1, 1], [], []>} : vector<16x32xbf16>, vector<32x32xbf16>, vector<16x32xf32> -> vector<16x32xf32>
    %34 = vector.broadcast %17 : vector<1x32xf32> to vector<16x32xf32>
    %35 = arith.addf %33, %34 : vector<16x32xf32>
    %36 = arith.truncf %24 : vector<16x32xf32> to vector<16x32xbf16>
    %cst_40 = arith.constant dense<0.000000e+00> : vector<16x32xf32>
    %37 = tpu.matmul %36, %7, %cst_40 {dimension_numbers = #tpu.dot_dimension_numbers<[1], [0], [0], [1], [0, 0, 1, 1], [], []>} : vector<16x32xbf16>, vector<32x32xbf16>, vector<16x32xf32> -> vector<16x32xf32>
    %38 = vector.broadcast %19 : vector<1x32xf32> to vector<16x32xf32>
    %39 = arith.addf %37, %38 : vector<16x32xf32>
    %cst_41 = arith.constant dense<0.000000e+00> : vector<16x32xf32>
    %40 = tpu.matmul %36, %9, %cst_41 {dimension_numbers = #tpu.dot_dimension_numbers<[1], [0], [0], [1], [0, 0, 1, 1], [], []>} : vector<16x32xbf16>, vector<32x32xbf16>, vector<16x32xf32> -> vector<16x32xf32>
    %41 = vector.broadcast %21 : vector<1x32xf32> to vector<16x32xf32>
    %42 = arith.addf %40, %41 : vector<16x32xf32>
    %cst_42 = arith.constant dense<0.000000e+00> : vector<16x32xf32>
    %43 = tpu.matmul %36, %11, %cst_42 {dimension_numbers = #tpu.dot_dimension_numbers<[1], [0], [0], [1], [0, 0, 1, 1], [], []>} : vector<16x32xbf16>, vector<32x32xbf16>, vector<16x32xf32> -> vector<16x32xf32>
    %44 = vector.broadcast %23 : vector<1x32xf32> to vector<16x32xf32>
    %45 = arith.addf %43, %44 : vector<16x32xf32>
    %46 = arith.addf %29, %39 : vector<16x32xf32>
    %47 = arith.negf %46 : vector<16x32xf32>
    %48 = math.exp %47 : vector<16x32xf32>
    %cst_43 = arith.constant 1.000000e+00 : f32
    %49 = vector.broadcast %cst_43 : f32 to vector<16x32xf32>
    %50 = arith.addf %49, %48 : vector<16x32xf32>
    %51 = arith.divf %49, %50 : vector<16x32xf32>
    %52 = arith.addf %32, %42 : vector<16x32xf32>
    %53 = arith.negf %52 : vector<16x32xf32>
    %54 = math.exp %53 : vector<16x32xf32>
    %cst_44 = arith.constant 1.000000e+00 : f32
    %55 = vector.broadcast %cst_44 : f32 to vector<16x32xf32>
    %56 = arith.addf %55, %54 : vector<16x32xf32>
    %57 = arith.divf %55, %56 : vector<16x32xf32>
    %58 = arith.mulf %51, %45 : vector<16x32xf32>
    %59 = arith.addf %35, %58 : vector<16x32xf32>
    %60 = math.tanh %59 : vector<16x32xf32>
    %cst_45 = arith.constant 1.000000e+00 : f32
    %61 = vector.broadcast %cst_45 : f32 to vector<16x32xf32>
    %62 = arith.subf %61, %57 : vector<16x32xf32>
    %63 = arith.mulf %62, %60 : vector<16x32xf32>
    %64 = arith.mulf %57, %24 : vector<16x32xf32>
    %65 = arith.addf %63, %64 : vector<16x32xf32>
    %c0_46 = arith.constant 0 : index
    %c0_47 = arith.constant 0 : index
    %c0_48 = arith.constant 0 : index
    %66 = vector.load %arg7[%c0_46, %c0_47, %c0_48] : memref<4x16x32xf32, #tpu.memory_space<vmem>>, vector<1x16x32xf32>
    %67 = vector.shape_cast %66 : vector<1x16x32xf32> to vector<16x32xf32>
    %68 = vector.shape_cast %65 : vector<16x32xf32> to vector<1x16x32xf32>
    tpu.vector_store %arg7[%c0_46, %c0_47, %c0_48], %68 {strides = array<i32>} : memref<4x16x32xf32, #tpu.memory_space<vmem>>, vector<1x16x32xf32>,
    %c1_49 = arith.constant 1 : index
    %c0_50 = arith.constant 0 : index
    %c0_51 = arith.constant 0 : index
    %69 = vector.load %arg1[%c1_49, %c0_50, %c0_51] : memref<4x16x32xbf16, #tpu.memory_space<vmem>>, vector<1x16x32xbf16>
    %70 = vector.shape_cast %69 : vector<1x16x32xbf16> to vector<16x32xbf16>
    %cst_52 = arith.constant dense<0.000000e+00> : vector<16x32xf32>
    %71 = tpu.matmul %70, %1, %cst_52 {dimension_numbers = #tpu.dot_dimension_numbers<[1], [0], [0], [1], [0, 0, 1, 1], [], []>} : vector<16x32xbf16>, vector<32x32xbf16>, vector<16x32xf32> -> vector<16x32xf32>
    %72 = vector.broadcast %13 : vector<1x32xf32> to vector<16x32xf32>
    %73 = arith.addf %71, %72 : vector<16x32xf32>
    %cst_53 = arith.constant dense<0.000000e+00> : vector<16x32xf32>
    %74 = tpu.matmul %70, %3, %cst_53 {dimension_numbers = #tpu.dot_dimension_numbers<[1], [0], [0], [1], [0, 0, 1, 1], [], []>} : vector<16x32xbf16>, vector<32x32xbf16>, vector<16x32xf32> -> vector<16x32xf32>
    %75 = vector.broadcast %15 : vector<1x32xf32> to vector<16x32xf32>
    %76 = arith.addf %74, %75 : vector<16x32xf32>
    %cst_54 = arith.constant dense<0.000000e+00> : vector<16x32xf32>
    %77 = tpu.matmul %70, %5, %cst_54 {dimension_numbers = #tpu.dot_dimension_numbers<[1], [0], [0], [1], [0, 0, 1, 1], [], []>} : vector<16x32xbf16>, vector<32x32xbf16>, vector<16x32xf32> -> vector<16x32xf32>
    %78 = vector.broadcast %17 : vector<1x32xf32> to vector<16x32xf32>
    %79 = arith.addf %77, %78 : vector<16x32xf32>
    %80 = arith.truncf %65 : vector<16x32xf32> to vector<16x32xbf16>
    %cst_55 = arith.constant dense<0.000000e+00> : vector<16x32xf32>
    %81 = tpu.matmul %80, %7, %cst_55 {dimension_numbers = #tpu.dot_dimension_numbers<[1], [0], [0], [1], [0, 0, 1, 1], [], []>} : vector<16x32xbf16>, vector<32x32xbf16>, vector<16x32xf32> -> vector<16x32xf32>
    %82 = vector.broadcast %19 : vector<1x32xf32> to vector<16x32xf32>
    %83 = arith.addf %81, %82 : vector<16x32xf32>
    %cst_56 = arith.constant dense<0.000000e+00> : vector<16x32xf32>
    %84 = tpu.matmul %80, %9, %cst_56 {dimension_numbers = #tpu.dot_dimension_numbers<[1], [0], [0], [1], [0, 0, 1, 1], [], []>} : vector<16x32xbf16>, vector<32x32xbf16>, vector<16x32xf32> -> vector<16x32xf32>
    %85 = vector.broadcast %21 : vector<1x32xf32> to vector<16x32xf32>
    %86 = arith.addf %84, %85 : vector<16x32xf32>
    %cst_57 = arith.constant dense<0.000000e+00> : vector<16x32xf32>
    %87 = tpu.matmul %80, %11, %cst_57 {dimension_numbers = #tpu.dot_dimension_numbers<[1], [0], [0], [1], [0, 0, 1, 1], [], []>} : vector<16x32xbf16>, vector<32x32xbf16>, vector<16x32xf32> -> vector<16x32xf32>
    %88 = vector.broadcast %23 : vector<1x32xf32> to vector<16x32xf32>
    %89 = arith.addf %87, %88 : vector<16x32xf32>
    %90 = arith.addf %73, %83 : vector<16x32xf32>
    %91 = arith.negf %90 : vector<16x32xf32>
    %92 = math.exp %91 : vector<16x32xf32>
    %cst_58 = arith.constant 1.000000e+00 : f32
    %93 = vector.broadcast %cst_58 : f32 to vector<16x32xf32>
    %94 = arith.addf %93, %92 : vector<16x32xf32>
    %95 = arith.divf %93, %94 : vector<16x32xf32>
    %96 = arith.addf %76, %86 : vector<16x32xf32>
    %97 = arith.negf %96 : vector<16x32xf32>
    %98 = math.exp %97 : vector<16x32xf32>
    %cst_59 = arith.constant 1.000000e+00 : f32
    %99 = vector.broadcast %cst_59 : f32 to vector<16x32xf32>
    %100 = arith.addf %99, %98 : vector<16x32xf32>
    %101 = arith.divf %99, %100 : vector<16x32xf32>
    %102 = arith.mulf %95, %89 : vector<16x32xf32>
    %103 = arith.addf %79, %102 : vector<16x32xf32>
    %104 = math.tanh %103 : vector<16x32xf32>
    %cst_60 = arith.constant 1.000000e+00 : f32
    %105 = vector.broadcast %cst_60 : f32 to vector<16x32xf32>
    %106 = arith.subf %105, %101 : vector<16x32xf32>
    %107 = arith.mulf %106, %104 : vector<16x32xf32>
    %108 = arith.mulf %101, %65 : vector<16x32xf32>
    %109 = arith.addf %107, %108 : vector<16x32xf32>
    %c1_61 = arith.constant 1 : index
    %c0_62 = arith.constant 0 : index
    %c0_63 = arith.constant 0 : index
    %110 = vector.load %arg7[%c1_61, %c0_62, %c0_63] : memref<4x16x32xf32, #tpu.memory_space<vmem>>, vector<1x16x32xf32>
    %111 = vector.shape_cast %110 : vector<1x16x32xf32> to vector<16x32xf32>
    %112 = vector.shape_cast %109 : vector<16x32xf32> to vector<1x16x32xf32>
    tpu.vector_store %arg7[%c1_61, %c0_62, %c0_63], %112 {strides = array<i32>} : memref<4x16x32xf32, #tpu.memory_space<vmem>>, vector<1x16x32xf32>,
    %c2_64 = arith.constant 2 : index
    %c0_65 = arith.constant 0 : index
    %c0_66 = arith.constant 0 : index
    %113 = vector.load %arg1[%c2_64, %c0_65, %c0_66] : memref<4x16x32xbf16, #tpu.memory_space<vmem>>, vector<1x16x32xbf16>
    %114 = vector.shape_cast %113 : vector<1x16x32xbf16> to vector<16x32xbf16>
    %cst_67 = arith.constant dense<0.000000e+00> : vector<16x32xf32>
    %115 = tpu.matmul %114, %1, %cst_67 {dimension_numbers = #tpu.dot_dimension_numbers<[1], [0], [0], [1], [0, 0, 1, 1], [], []>} : vector<16x32xbf16>, vector<32x32xbf16>, vector<16x32xf32> -> vector<16x32xf32>
    %116 = vector.broadcast %13 : vector<1x32xf32> to vector<16x32xf32>
    %117 = arith.addf %115, %116 : vector<16x32xf32>
    %cst_68 = arith.constant dense<0.000000e+00> : vector<16x32xf32>
    %118 = tpu.matmul %114, %3, %cst_68 {dimension_numbers = #tpu.dot_dimension_numbers<[1], [0], [0], [1], [0, 0, 1, 1], [], []>} : vector<16x32xbf16>, vector<32x32xbf16>, vector<16x32xf32> -> vector<16x32xf32>
    %119 = vector.broadcast %15 : vector<1x32xf32> to vector<16x32xf32>
    %120 = arith.addf %118, %119 : vector<16x32xf32>
    %cst_69 = arith.constant dense<0.000000e+00> : vector<16x32xf32>
    %121 = tpu.matmul %114, %5, %cst_69 {dimension_numbers = #tpu.dot_dimension_numbers<[1], [0], [0], [1], [0, 0, 1, 1], [], []>} : vector<16x32xbf16>, vector<32x32xbf16>, vector<16x32xf32> -> vector<16x32xf32>
    %122 = vector.broadcast %17 : vector<1x32xf32> to vector<16x32xf32>
    %123 = arith.addf %121, %122 : vector<16x32xf32>
    %124 = arith.truncf %109 : vector<16x32xf32> to vector<16x32xbf16>
    %cst_70 = arith.constant dense<0.000000e+00> : vector<16x32xf32>
    %125 = tpu.matmul %124, %7, %cst_70 {dimension_numbers = #tpu.dot_dimension_numbers<[1], [0], [0], [1], [0, 0, 1, 1], [], []>} : vector<16x32xbf16>, vector<32x32xbf16>, vector<16x32xf32> -> vector<16x32xf32>
    %126 = vector.broadcast %19 : vector<1x32xf32> to vector<16x32xf32>
    %127 = arith.addf %125, %126 : vector<16x32xf32>
    %cst_71 = arith.constant dense<0.000000e+00> : vector<16x32xf32>
    %128 = tpu.matmul %124, %9, %cst_71 {dimension_numbers = #tpu.dot_dimension_numbers<[1], [0], [0], [1], [0, 0, 1, 1], [], []>} : vector<16x32xbf16>, vector<32x32xbf16>, vector<16x32xf32> -> vector<16x32xf32>
    %129 = vector.broadcast %21 : vector<1x32xf32> to vector<16x32xf32>
    %130 = arith.addf %128, %129 : vector<16x32xf32>
    %cst_72 = arith.constant dense<0.000000e+00> : vector<16x32xf32>
    %131 = tpu.matmul %124, %11, %cst_72 {dimension_numbers = #tpu.dot_dimension_numbers<[1], [0], [0], [1], [0, 0, 1, 1], [], []>} : vector<16x32xbf16>, vector<32x32xbf16>, vector<16x32xf32> -> vector<16x32xf32>
    %132 = vector.broadcast %23 : vector<1x32xf32> to vector<16x32xf32>
    %133 = arith.addf %131, %132 : vector<16x32xf32>
    %134 = arith.addf %117, %127 : vector<16x32xf32>
    %135 = arith.negf %134 : vector<16x32xf32>
    %136 = math.exp %135 : vector<16x32xf32>
    %cst_73 = arith.constant 1.000000e+00 : f32
    %137 = vector.broadcast %cst_73 : f32 to vector<16x32xf32>
    %138 = arith.addf %137, %136 : vector<16x32xf32>
    %139 = arith.divf %137, %138 : vector<16x32xf32>
    %140 = arith.addf %120, %130 : vector<16x32xf32>
    %141 = arith.negf %140 : vector<16x32xf32>
    %142 = math.exp %141 : vector<16x32xf32>
    %cst_74 = arith.constant 1.000000e+00 : f32
    %143 = vector.broadcast %cst_74 : f32 to vector<16x32xf32>
    %144 = arith.addf %143, %142 : vector<16x32xf32>
    %145 = arith.divf %143, %144 : vector<16x32xf32>
    %146 = arith.mulf %139, %133 : vector<16x32xf32>
    %147 = arith.addf %123, %146 : vector<16x32xf32>
    %148 = math.tanh %147 : vector<16x32xf32>
    %cst_75 = arith.constant 1.000000e+00 : f32
    %149 = vector.broadcast %cst_75 : f32 to vector<16x32xf32>
    %150 = arith.subf %149, %145 : vector<16x32xf32>
    %151 = arith.mulf %150, %148 : vector<16x32xf32>
    %152 = arith.mulf %145, %109 : vector<16x32xf32>
    %153 = arith.addf %151, %152 : vector<16x32xf32>
    %c2_76 = arith.constant 2 : index
    %c0_77 = arith.constant 0 : index
    %c0_78 = arith.constant 0 : index
    %154 = vector.load %arg7[%c2_76, %c0_77, %c0_78] : memref<4x16x32xf32, #tpu.memory_space<vmem>>, vector<1x16x32xf32>
    %155 = vector.shape_cast %154 : vector<1x16x32xf32> to vector<16x32xf32>
    %156 = vector.shape_cast %153 : vector<16x32xf32> to vector<1x16x32xf32>
    tpu.vector_store %arg7[%c2_76, %c0_77, %c0_78], %156 {strides = array<i32>} : memref<4x16x32xf32, #tpu.memory_space<vmem>>, vector<1x16x32xf32>,
    %c3 = arith.constant 3 : index
    %c0_79 = arith.constant 0 : index
    %c0_80 = arith.constant 0 : index
    %157 = vector.load %arg1[%c3, %c0_79, %c0_80] : memref<4x16x32xbf16, #tpu.memory_space<vmem>>, vector<1x16x32xbf16>
    %158 = vector.shape_cast %157 : vector<1x16x32xbf16> to vector<16x32xbf16>
    %cst_81 = arith.constant dense<0.000000e+00> : vector<16x32xf32>
    %159 = tpu.matmul %158, %1, %cst_81 {dimension_numbers = #tpu.dot_dimension_numbers<[1], [0], [0], [1], [0, 0, 1, 1], [], []>} : vector<16x32xbf16>, vector<32x32xbf16>, vector<16x32xf32> -> vector<16x32xf32>
    %160 = vector.broadcast %13 : vector<1x32xf32> to vector<16x32xf32>
    %161 = arith.addf %159, %160 : vector<16x32xf32>
    %cst_82 = arith.constant dense<0.000000e+00> : vector<16x32xf32>
    %162 = tpu.matmul %158, %3, %cst_82 {dimension_numbers = #tpu.dot_dimension_numbers<[1], [0], [0], [1], [0, 0, 1, 1], [], []>} : vector<16x32xbf16>, vector<32x32xbf16>, vector<16x32xf32> -> vector<16x32xf32>
    %163 = vector.broadcast %15 : vector<1x32xf32> to vector<16x32xf32>
    %164 = arith.addf %162, %163 : vector<16x32xf32>
    %cst_83 = arith.constant dense<0.000000e+00> : vector<16x32xf32>
    %165 = tpu.matmul %158, %5, %cst_83 {dimension_numbers = #tpu.dot_dimension_numbers<[1], [0], [0], [1], [0, 0, 1, 1], [], []>} : vector<16x32xbf16>, vector<32x32xbf16>, vector<16x32xf32> -> vector<16x32xf32>
    %166 = vector.broadcast %17 : vector<1x32xf32> to vector<16x32xf32>
    %167 = arith.addf %165, %166 : vector<16x32xf32>
    %168 = arith.truncf %153 : vector<16x32xf32> to vector<16x32xbf16>
    %cst_84 = arith.constant dense<0.000000e+00> : vector<16x32xf32>
    %169 = tpu.matmul %168, %7, %cst_84 {dimension_numbers = #tpu.dot_dimension_numbers<[1], [0], [0], [1], [0, 0, 1, 1], [], []>} : vector<16x32xbf16>, vector<32x32xbf16>, vector<16x32xf32> -> vector<16x32xf32>
    %170 = vector.broadcast %19 : vector<1x32xf32> to vector<16x32xf32>
    %171 = arith.addf %169, %170 : vector<16x32xf32>
    %cst_85 = arith.constant dense<0.000000e+00> : vector<16x32xf32>
    %172 = tpu.matmul %168, %9, %cst_85 {dimension_numbers = #tpu.dot_dimension_numbers<[1], [0], [0], [1], [0, 0, 1, 1], [], []>} : vector<16x32xbf16>, vector<32x32xbf16>, vector<16x32xf32> -> vector<16x32xf32>
    %173 = vector.broadcast %21 : vector<1x32xf32> to vector<16x32xf32>
    %174 = arith.addf %172, %173 : vector<16x32xf32>
    %cst_86 = arith.constant dense<0.000000e+00> : vector<16x32xf32>
    %175 = tpu.matmul %168, %11, %cst_86 {dimension_numbers = #tpu.dot_dimension_numbers<[1], [0], [0], [1], [0, 0, 1, 1], [], []>} : vector<16x32xbf16>, vector<32x32xbf16>, vector<16x32xf32> -> vector<16x32xf32>
    %176 = vector.broadcast %23 : vector<1x32xf32> to vector<16x32xf32>
    %177 = arith.addf %175, %176 : vector<16x32xf32>
    %178 = arith.addf %161, %171 : vector<16x32xf32>
    %179 = arith.negf %178 : vector<16x32xf32>
    %180 = math.exp %179 : vector<16x32xf32>
    %cst_87 = arith.constant 1.000000e+00 : f32
    %181 = vector.broadcast %cst_87 : f32 to vector<16x32xf32>
    %182 = arith.addf %181, %180 : vector<16x32xf32>
    %183 = arith.divf %181, %182 : vector<16x32xf32>
    %184 = arith.addf %164, %174 : vector<16x32xf32>
    %185 = arith.negf %184 : vector<16x32xf32>
    %186 = math.exp %185 : vector<16x32xf32>
    %cst_88 = arith.constant 1.000000e+00 : f32
    %187 = vector.broadcast %cst_88 : f32 to vector<16x32xf32>
    %188 = arith.addf %187, %186 : vector<16x32xf32>
    %189 = arith.divf %187, %188 : vector<16x32xf32>
    %190 = arith.mulf %183, %177 : vector<16x32xf32>
    %191 = arith.addf %167, %190 : vector<16x32xf32>
    %192 = math.tanh %191 : vector<16x32xf32>
    %cst_89 = arith.constant 1.000000e+00 : f32
    %193 = vector.broadcast %cst_89 : f32 to vector<16x32xf32>
    %194 = arith.subf %193, %189 : vector<16x32xf32>
    %195 = arith.mulf %194, %192 : vector<16x32xf32>
    %196 = arith.mulf %189, %153 : vector<16x32xf32>
    %197 = arith.addf %195, %196 : vector<16x32xf32>
    %c3_90 = arith.constant 3 : index
    %c0_91 = arith.constant 0 : index
    %c0_92 = arith.constant 0 : index
    %198 = vector.load %arg7[%c3_90, %c0_91, %c0_92] : memref<4x16x32xf32, #tpu.memory_space<vmem>>, vector<1x16x32xf32>
    %199 = vector.shape_cast %198 : vector<1x16x32xf32> to vector<16x32xf32>
    %200 = vector.shape_cast %197 : vector<16x32xf32> to vector<1x16x32xf32>
    tpu.vector_store %arg7[%c3_90, %c0_91, %c0_92], %200 {strides = array<i32>} : memref<4x16x32xf32, #tpu.memory_space<vmem>>, vector<1x16x32xf32>,
    return
  }
  func.func @transform_0(%arg0: i32) -> (i32, i32, i32) {
    %c0_i32 = arith.constant 0 : i32
    %c0_i32_0 = arith.constant 0 : i32
    %c0_i32_1 = arith.constant 0 : i32
    return %c0_i32, %arg0, %c0_i32_0 : i32, i32, i32
  }
  func.func @transform_1(%arg0: i32) -> (i32, i32) {
    %c0_i32 = arith.constant 0 : i32
    %c0_i32_0 = arith.constant 0 : i32
    return %arg0, %c0_i32 : i32, i32
  }
  func.func @transform_2(%arg0: i32) -> (i32, i32, i32) {
    %c0_i32 = arith.constant 0 : i32
    %c0_i32_0 = arith.constant 0 : i32
    %c0_i32_1 = arith.constant 0 : i32
    %c0_i32_2 = arith.constant 0 : i32
    return %c0_i32, %c0_i32_0, %c0_i32_1 : i32, i32, i32
  }
  func.func @transform_3(%arg0: i32) -> (i32, i32, i32) {
    %c0_i32 = arith.constant 0 : i32
    %c0_i32_0 = arith.constant 0 : i32
    %c0_i32_1 = arith.constant 0 : i32
    %c0_i32_2 = arith.constant 0 : i32
    return %c0_i32, %c0_i32_0, %c0_i32_1 : i32, i32, i32
  }
  func.func @transform_4(%arg0: i32) -> (i32, i32, i32) {
    %c0_i32 = arith.constant 0 : i32
    %c0_i32_0 = arith.constant 0 : i32
    %c0_i32_1 = arith.constant 0 : i32
    %c0_i32_2 = arith.constant 0 : i32
    return %c0_i32, %c0_i32_0, %c0_i32_1 : i32, i32, i32
  }
  func.func @transform_5(%arg0: i32) -> (i32, i32, i32) {
    %c0_i32 = arith.constant 0 : i32
    %c0_i32_0 = arith.constant 0 : i32
    %c0_i32_1 = arith.constant 0 : i32
    %c0_i32_2 = arith.constant 0 : i32
    return %c0_i32, %c0_i32_0, %c0_i32_1 : i32, i32, i32
  }
  func.func @transform_6(%arg0: i32) -> (i32, i32, i32) {
    %c0_i32 = arith.constant 0 : i32
    %c0_i32_0 = arith.constant 0 : i32
    %c0_i32_1 = arith.constant 0 : i32
    return %c0_i32, %arg0, %c0_i32_0 : i32, i32, i32
  }
}

module attributes {stable_mosaic.version = 11 : i64} {
  func.func @_pred_loss_kernel(%arg0: i32, %arg1: i32, %arg2: memref<32x32xbf16, #tpu.memory_space<vmem>>, %arg3: memref<1x32x32xbf16, #tpu.memory_space<vmem>>, %arg4: memref<32x1xf32, #tpu.memory_space<vmem>>, %arg5: memref<32x32xbf16, #tpu.memory_space<vmem>>, %arg6: memref<32x32xbf16, #tpu.memory_space<vmem>>, %arg7: memref<1x32xf32, #tpu.memory_space<vmem>>, %arg8: memref<32x32xbf16, #tpu.memory_space<vmem>>, %arg9: memref<1x32xf32, #tpu.memory_space<vmem>>, %arg10: memref<1x32xf32, #tpu.memory_space<vmem>>, %arg11: memref<1x1xf32, #tpu.memory_space<vmem>>, %arg12: memref<1x1x128xf32, #tpu.memory_space<vmem>>, %arg13: memref<32x32xf32, #tpu.memory_space<vmem>>) attributes {dimension_semantics = [#tpu.dimension_semantics<parallel>, #tpu.dimension_semantics<arbitrary>], iteration_bounds = array<i64: 1, 21>, scalar_prefetch = 0 : i64, scratch_operands = 1 : i64, tpu.core_type = #tpu.core_type<tc>, window_params = [{transform_indices = @transform_0, window_bounds = array<i64: 32, 32>}, {transform_indices = @transform_1, window_bounds = array<i64: 1, 32, 32>}, {transform_indices = @transform_2, window_bounds = array<i64: 32, 1>}, {pipeline_mode = #tpu.pipeline_mode<synchronous>, transform_indices = @transform_3, window_bounds = array<i64: 32, 32>}, {pipeline_mode = #tpu.pipeline_mode<synchronous>, transform_indices = @transform_4, window_bounds = array<i64: 32, 32>}, {pipeline_mode = #tpu.pipeline_mode<synchronous>, transform_indices = @transform_5, window_bounds = array<i64: 1, 32>}, {pipeline_mode = #tpu.pipeline_mode<synchronous>, transform_indices = @transform_6, window_bounds = array<i64: 32, 32>}, {pipeline_mode = #tpu.pipeline_mode<synchronous>, transform_indices = @transform_7, window_bounds = array<i64: 1, 32>}, {pipeline_mode = #tpu.pipeline_mode<synchronous>, transform_indices = @transform_8, window_bounds = array<i64: 1, 32>}, {pipeline_mode = #tpu.pipeline_mode<synchronous>, transform_indices = @transform_9, window_bounds = array<i64: 1, 1>}, {transform_indices = @transform_10, window_bounds = array<i64: 1, 1, 128>}]} {
    %c0_i32 = arith.constant 0 : i32
    %0 = arith.cmpi eq, %arg1, %c0_i32 : i32
    %1 = arith.extui %0 : i1 to i32
    %c0_i32_0 = arith.constant 0 : i32
    %2 = arith.cmpi ne, %1, %c0_i32_0 : i32
    scf.if %2 {
      %cst_37 = arith.constant 0.000000e+00 : f32
      %59 = vector.broadcast %cst_37 : f32 to vector<1x1x128xf32>
      %c0_38 = arith.constant 0 : index
      %c0_39 = arith.constant 0 : index
      %c0_40 = arith.constant 0 : index
      %60 = vector.load %arg12[%c0_38, %c0_39, %c0_40] : memref<1x1x128xf32, #tpu.memory_space<vmem>>, vector<1x1x128xf32>
      tpu.vector_store %arg12[%c0_38, %c0_39, %c0_40], %59 {strides = array<i32>} : memref<1x1x128xf32, #tpu.memory_space<vmem>>, vector<1x1x128xf32>,
      %c0_41 = arith.constant 0 : index
      %c0_42 = arith.constant 0 : index
      %61 = vector.load %arg2[%c0_41, %c0_42] : memref<32x32xbf16, #tpu.memory_space<vmem>>, vector<32x32xbf16>
      %c0_43 = arith.constant 0 : index
      %c0_44 = arith.constant 0 : index
      %62 = vector.load %arg5[%c0_43, %c0_44] : memref<32x32xbf16, #tpu.memory_space<vmem>>, vector<32x32xbf16>
      %cst_45 = arith.constant dense<0.000000e+00> : vector<32x32xf32>
      %63 = tpu.matmul %61, %62, %cst_45 {dimension_numbers = #tpu.dot_dimension_numbers<[1], [0], [0], [1], [0, 0, 1, 1], [], []>} : vector<32x32xbf16>, vector<32x32xbf16>, vector<32x32xf32> -> vector<32x32xf32>
      %c0_46 = arith.constant 0 : index
      %c0_47 = arith.constant 0 : index
      %64 = vector.load %arg7[%c0_46, %c0_47] : memref<1x32xf32, #tpu.memory_space<vmem>>, vector<1x32xf32>
      %65 = vector.broadcast %64 : vector<1x32xf32> to vector<32x32xf32>
      %66 = arith.addf %63, %65 : vector<32x32xf32>
      %c0_48 = arith.constant 0 : index
      %c0_49 = arith.constant 0 : index
      %67 = vector.load %arg13[%c0_48, %c0_49] : memref<32x32xf32, #tpu.memory_space<vmem>>, vector<32x32xf32>
      tpu.vector_store %arg13[%c0_48, %c0_49], %66 {strides = array<i32>} : memref<32x32xf32, #tpu.memory_space<vmem>>, vector<32x32xf32>,
    } else {
    }
    %c0 = arith.constant 0 : index
    %c0_1 = arith.constant 0 : index
    %c0_2 = arith.constant 0 : index
    %3 = vector.load %arg3[%c0, %c0_1, %c0_2] : memref<1x32x32xbf16, #tpu.memory_space<vmem>>, vector<1x32x32xbf16>
    %4 = vector.shape_cast %3 : vector<1x32x32xbf16> to vector<32x32xbf16>
    %c0_3 = arith.constant 0 : index
    %c0_4 = arith.constant 0 : index
    %5 = vector.load %arg13[%c0_3, %c0_4] : memref<32x32xf32, #tpu.memory_space<vmem>>, vector<32x32xf32>
    %c0_5 = arith.constant 0 : index
    %c0_6 = arith.constant 0 : index
    %6 = vector.load %arg6[%c0_5, %c0_6] : memref<32x32xbf16, #tpu.memory_space<vmem>>, vector<32x32xbf16>
    %cst = arith.constant dense<0.000000e+00> : vector<32x32xf32>
    %7 = tpu.matmul %4, %6, %cst {dimension_numbers = #tpu.dot_dimension_numbers<[1], [0], [0], [1], [0, 0, 1, 1], [], []>} : vector<32x32xbf16>, vector<32x32xbf16>, vector<32x32xf32> -> vector<32x32xf32>
    %8 = arith.addf %5, %7 : vector<32x32xf32>
    %cst_7 = arith.constant 0.000000e+00 : f32
    %9 = vector.broadcast %cst_7 : f32 to vector<32x32xf32>
    %10 = arith.maximumf %8, %9 : vector<32x32xf32>
    %11 = arith.truncf %10 : vector<32x32xf32> to vector<32x32xbf16>
    %c0_8 = arith.constant 0 : index
    %c0_9 = arith.constant 0 : index
    %12 = vector.load %arg8[%c0_8, %c0_9] : memref<32x32xbf16, #tpu.memory_space<vmem>>, vector<32x32xbf16>
    %cst_10 = arith.constant dense<0.000000e+00> : vector<32x32xf32>
    %13 = tpu.matmul %11, %12, %cst_10 {dimension_numbers = #tpu.dot_dimension_numbers<[1], [0], [0], [1], [0, 0, 1, 1], [], []>} : vector<32x32xbf16>, vector<32x32xbf16>, vector<32x32xf32> -> vector<32x32xf32>
    %c0_11 = arith.constant 0 : index
    %c0_12 = arith.constant 0 : index
    %14 = vector.load %arg9[%c0_11, %c0_12] : memref<1x32xf32, #tpu.memory_space<vmem>>, vector<1x32xf32>
    %15 = vector.broadcast %14 : vector<1x32xf32> to vector<32x32xf32>
    %16 = arith.addf %13, %15 : vector<32x32xf32>
    %cst_13 = arith.constant 0.000000e+00 : f32
    %17 = vector.broadcast %cst_13 : f32 to vector<32x32xf32>
    %18 = arith.maximumf %16, %17 : vector<32x32xf32>
    %c0_14 = arith.constant 0 : index
    %c0_15 = arith.constant 0 : index
    %19 = vector.load %arg10[%c0_14, %c0_15] : memref<1x32xf32, #tpu.memory_space<vmem>>, vector<1x32xf32>
    %20 = vector.broadcast %19 : vector<1x32xf32> to vector<32x32xf32>
    %21 = arith.mulf %18, %20 : vector<32x32xf32>
    %cst_16 = arith.constant dense<0.000000e+00> : vector<32xf32>
    %22 = vector.multi_reduction <add>, %21, %cst_16 [1] : vector<32x32xf32> to vector<32xf32>
    %23 = vector.shape_cast %22 : vector<32xf32> to vector<32x1xf32>
    %c0_17 = arith.constant 0 : index
    %c0_18 = arith.constant 0 : index
    %24 = vector.load %arg11[%c0_17, %c0_18] : memref<1x1xf32, #tpu.memory_space<vmem>>, vector<1x1xf32>
    %25 = vector.broadcast %24 : vector<1x1xf32> to vector<32x1xf32>
    %26 = arith.addf %23, %25 : vector<32x1xf32>
    %c0_i32_19 = arith.constant 0 : i32
    %27 = arith.cmpi eq, %arg1, %c0_i32_19 : i32
    %cst_20 = arith.constant 1.000000e+00 : f32
    %cst_21 = arith.constant 0.000000e+00 : f32
    %28 = arith.select %27, %cst_20, %cst_21 : f32
    %cst_22 = arith.constant 0.000000e+00 : f32
    %29 = vector.broadcast %cst_22 : f32 to vector<32x1xf32>
    %30 = arith.maximumf %26, %29 : vector<32x1xf32>
    %31 = vector.broadcast %28 : f32 to vector<32x1xf32>
    %32 = arith.mulf %26, %31 : vector<32x1xf32>
    %33 = arith.subf %30, %32 : vector<32x1xf32>
    %34 = math.absf %26 : vector<32x1xf32>
    %cst_23 = arith.constant 0.000000e+00 : f32
    %35 = vector.broadcast %cst_23 : f32 to vector<32x1xf32>
    %36 = arith.subf %35, %34 : vector<32x1xf32>
    %37 = math.exp %36 : vector<32x1xf32>
    %cst_24 = arith.constant 1.000000e+00 : f32
    %38 = vector.broadcast %cst_24 : f32 to vector<32x1xf32>
    %39 = arith.addf %38, %37 : vector<32x1xf32>
    %40 = math.log %39 : vector<32x1xf32>
    %41 = arith.addf %33, %40 : vector<32x1xf32>
    %c0_25 = arith.constant 0 : index
    %c0_26 = arith.constant 0 : index
    %42 = vector.load %arg4[%c0_25, %c0_26] : memref<32x1xf32, #tpu.memory_space<vmem>>, vector<32x1xf32>
    %43 = arith.mulf %41, %42 : vector<32x1xf32>
    %44 = vector.shape_cast %43 : vector<32x1xf32> to vector<1x32x1xf32>
    %cst_27 = arith.constant dense<0.000000e+00> : vector<1xf32>
    %45 = vector.multi_reduction <add>, %44, %cst_27 [1, 2] : vector<1x32x1xf32> to vector<1xf32>
    %46 = vector.shape_cast %45 : vector<1xf32> to vector<1x1x1xf32>
    %47 = vector.extract %46[0, 0, 0] : f32 from vector<1x1x1xf32>
    %48 = tpu.iota {dimensions = array<i32: 2>} : vector<1x1x128xi32>
    %c0_i32_28 = arith.constant 0 : i32
    %49 = arith.cmpi eq, %arg1, %c0_i32_28 : i32
    %c0_i32_29 = arith.constant 0 : i32
    %c1_i32 = arith.constant 1 : i32
    %50 = arith.select %49, %c0_i32_29, %c1_i32 : i32
    %c0_30 = arith.constant 0 : index
    %c0_31 = arith.constant 0 : index
    %c0_32 = arith.constant 0 : index
    %51 = vector.load %arg12[%c0_30, %c0_31, %c0_32] : memref<1x1x128xf32, #tpu.memory_space<vmem>>, vector<1x1x128xf32>
    %52 = vector.broadcast %50 : i32 to vector<1x1x128xi32>
    %53 = arith.cmpi eq, %48, %52 : vector<1x1x128xi32>
    %cst_33 = arith.constant 0.000000e+00 : f32
    %54 = vector.broadcast %47 : f32 to vector<1x1x128xf32>
    %55 = vector.broadcast %cst_33 : f32 to vector<1x1x128xf32>
    %56 = arith.select %53, %54, %55 : vector<1x1x128xi1>, vector<1x1x128xf32>
    %57 = arith.addf %51, %56 : vector<1x1x128xf32>
    %c0_34 = arith.constant 0 : index
    %c0_35 = arith.constant 0 : index
    %c0_36 = arith.constant 0 : index
    %58 = vector.load %arg12[%c0_34, %c0_35, %c0_36] : memref<1x1x128xf32, #tpu.memory_space<vmem>>, vector<1x1x128xf32>
    tpu.vector_store %arg12[%c0_34, %c0_35, %c0_36], %57 {strides = array<i32>} : memref<1x1x128xf32, #tpu.memory_space<vmem>>, vector<1x1x128xf32>,
    return
  }
  func.func @transform_0(%arg0: i32, %arg1: i32) -> (i32, i32) {
    %c0_i32 = arith.constant 0 : i32
    %c0_i32_0 = arith.constant 0 : i32
    return %arg0, %c0_i32 : i32, i32
  }
  func.func @transform_1(%arg0: i32, %arg1: i32) -> (i32, i32, i32) {
    %c0_i32 = arith.constant 0 : i32
    %c0_i32_0 = arith.constant 0 : i32
    return %arg1, %arg0, %c0_i32 : i32, i32, i32
  }
  func.func @transform_2(%arg0: i32, %arg1: i32) -> (i32, i32) {
    %c0_i32 = arith.constant 0 : i32
    %c0_i32_0 = arith.constant 0 : i32
    return %arg0, %c0_i32 : i32, i32
  }
  func.func @transform_3(%arg0: i32, %arg1: i32) -> (i32, i32) {
    %c0_i32 = arith.constant 0 : i32
    %c0_i32_0 = arith.constant 0 : i32
    %c0_i32_1 = arith.constant 0 : i32
    return %c0_i32, %c0_i32_0 : i32, i32
  }
  func.func @transform_4(%arg0: i32, %arg1: i32) -> (i32, i32) {
    %c0_i32 = arith.constant 0 : i32
    %c0_i32_0 = arith.constant 0 : i32
    %c0_i32_1 = arith.constant 0 : i32
    return %c0_i32, %c0_i32_0 : i32, i32
  }
  func.func @transform_5(%arg0: i32, %arg1: i32) -> (i32, i32) {
    %c0_i32 = arith.constant 0 : i32
    %c0_i32_0 = arith.constant 0 : i32
    %c0_i32_1 = arith.constant 0 : i32
    return %c0_i32, %c0_i32_0 : i32, i32
  }
  func.func @transform_6(%arg0: i32, %arg1: i32) -> (i32, i32) {
    %c0_i32 = arith.constant 0 : i32
    %c0_i32_0 = arith.constant 0 : i32
    %c0_i32_1 = arith.constant 0 : i32
    return %c0_i32, %c0_i32_0 : i32, i32
  }
  func.func @transform_7(%arg0: i32, %arg1: i32) -> (i32, i32) {
    %c0_i32 = arith.constant 0 : i32
    %c0_i32_0 = arith.constant 0 : i32
    %c0_i32_1 = arith.constant 0 : i32
    return %c0_i32, %c0_i32_0 : i32, i32
  }
  func.func @transform_8(%arg0: i32, %arg1: i32) -> (i32, i32) {
    %c0_i32 = arith.constant 0 : i32
    %c0_i32_0 = arith.constant 0 : i32
    %c0_i32_1 = arith.constant 0 : i32
    return %c0_i32, %c0_i32_0 : i32, i32
  }
  func.func @transform_9(%arg0: i32, %arg1: i32) -> (i32, i32) {
    %c0_i32 = arith.constant 0 : i32
    %c0_i32_0 = arith.constant 0 : i32
    %c0_i32_1 = arith.constant 0 : i32
    return %c0_i32, %c0_i32_0 : i32, i32
  }
  func.func @transform_10(%arg0: i32, %arg1: i32) -> (i32, i32, i32) {
    %c0_i32 = arith.constant 0 : i32
    %c0_i32_0 = arith.constant 0 : i32
    %c0_i32_1 = arith.constant 0 : i32
    return %arg0, %c0_i32, %c0_i32_0 : i32, i32, i32
  }
}

</mosaic_0001>

<bundles_post_ra>
// kernel: tpu_custom_call.1
= control target key start
LH: loop header
LB: loop body
LE: loop exit
PB: predicated region body
PF: predicated region fallthrough
CT: control target
= control target key end

     0   :  { %6 = vsyncpa [#allocation3], 0  ;;  %s482_s0 = inlined_call_operand.hbm [shape: f32[8,128], index: 0, kind: input, shape index: {}]   ;;  %s483_s1 = inlined_call_operand.hbm [shape: f32[16,128], index: 1, kind: output, shape index: {}]  }
   0x1   :  { %7 = vsyncpa [#allocation4], 0 }
   0x2   :  { %9 = vsyncpa [#allocation4 + $0x1], 0  ;;  %s352_s6 = smov 0   ;;  %s354_s7 = smov 0  }
   0x3   :  { %s356_s8 = smov 0   ;;  %s358_s9 = smov 0  }
   0x4 LB: > { %s373_s10 = sadd.s32 4294967295, %s338_s9   ;;  %s184_s11 = sadd.s32 4294967294, %s338_s9   ;;  %s338_s9 = sphi %s358_s9, %s499_s9   ;;  %s334_s8 = sphi %s356_s8, %s498_s8   ;;  %s330_s7 = sphi %s354_s7, %s497_s7   ;;  %s326_s6 = sphi %s352_s6, %s496_s6  }
   0x5   : > { %s377_s12 = sadd.s32 1, %s338_s9   ;;  %s43_s13 = sadd.s32 1, %s334_s8 }
   0x6   : > { %s40_s14 = ssub.s32 %s338_s9, %s377_s12  ;;  %p53_p0 = scmp.ne.s32.totalorder %s334_s8, %s330_s7 }
   0x7   : > { %p41_p1 = scmp.eq.s32.totalorder %s40_s14, 0  ;;  %p54_p2 = scmp.eq.s32.totalorder %s373_s10, 1 }
   0x8   : > { %p59_p3 = scmp.ne.s32.totalorder %s330_s7, %s326_s6  ;;  %p60_p4 = scmp.eq.s32.totalorder %s184_s11, 1 }
   0x9   : > { %s388_s15 = scalar_select %p41_p1, %s334_s8, %s43_s13  }
   0xa   : > { %p390_p5 = por %p54_p2, %p53_p0  ;;  %p394_p6 = por %p60_p4, %p59_p3 }
   0xb   : > { %p185_p7 = scmp.ge.s32.totalorder %s338_s9, 1  ;;  %p67_p8 = scmp.lt.s32.totalorder %s338_s9, 3 }
   0xc   : > { %s487_s16 = scalar_select %p390_p5, 1, 0 }
   0xd   : > { %s488_s17 = scalar_select %p394_p6, 1, 0 }
   0xe   : > { %p484_p9 = scmp.eq.s32.totalorder %s373_s10, 0  ;;  %p401_p10 = pnand %p185_p7, %p67_p8 }
   0xf   : > { %s340_s19 = smov [#allocation2]   ;;  %s244_s24 = scalar_lea.hbm %s482_s0, 128 }
  0x10   : > { %s489_s18 = scalar_select %p401_p10, 1, 0 }
  0x11   : > { %s80_s20 = sshll.u32 %s340_s19, 4  ;;  %p200_p11 = pneg %p401_p10  ;;  %s81_s20 = int_to_ptr.vmem [resolvable:$true] %s80_s20 }
  0x12   : > { %p245_p13 = scmp.ne.s32.totalorder %s482_s0, %s244_s24  ;;  %p251_p3 = scmp.lt.u32.totalorder %s244_s24, %s482_s0 }
  0x13   : > { %p409_p12 = pnand %p484_p9, %p200_p11 }
  0x15   : > { %p246_p0 = pneg %p409_p12 }
  0x17   : > { %p247_p1 = pnand %p246_p0, %p245_p13 }
  0x19   : > { %p248_p2 = pneg %p247_p1 }
  0x1b   : > { %p253_p4 = pnand %p251_p3, %p248_p2 }
  0x1d   : > { %256 = shalt.err (!%p253_p4)
}
  0x1e   : > { %s257_s29 = scalar_lea.vmem %s81_s20, 128  ;;  %p265_p9 = scmp.lt.s32.totalorder %s81_s20, %s81_s20 }
  0x1f   : > { %p258_p7 = scmp.ne.s32.totalorder %s81_s20, %s257_s29  ;;  %p266_p6 = scmp.lt.s32.totalorder %s257_s29, %s257_s29 }
  0x21   : > { %p260_p8 = pnand %p258_p7, %p246_p0  ;;  %p267_p5 = por %p266_p6, %p265_p9 }
  0x23   : > { %p261_p11 = pneg %p260_p8 }
  0x25   : > { %p268_p10 = pnand %p267_p5, %p261_p11 }
  0x27   : > { %271 = shalt.err (!%p268_p10)
}
  0x28   : > { %203 = dma.hbm_to_vmem [thread:$0]  (!%p409_p12), %s482_s0, 128, %s81_s20, [#allocation3]  }
  0x29   : > { %p491_p13 = scmp.ne.s32.totalorder %s489_s18, 0 }
  0x2a   : > { %p492_p1 = scmp.eq.s32.totalorder (!%p491_p13), %s373_s10, 0 }
  0x2b   : > { %93 = sbr.rel (%p491_p13) target bundleno = 77 (0x4d), region = 24 }
  0x32   : > { %317 = dma.done.wait (%p492_p1), [#allocation3], 128   ;;  %p493_p0 = pmov %p492_p1 }
  0x33   : > { %s105_s3 = sand.u32 1, %s330_s7   ;;  %s191_s13 = sshll.u32 %s373_s10, 7  ;;  %v108_v0 = vld [vmem:[#allocation2] sm:$0xff] }
  0x34   : > { %319 = vsyncadd (%p493_p0), [#allocation3], 4294967168  ;;  %s189_s4 = sshll.u32 %s105_s3, 3  ;;  %v109_v1 = vadd.f32 1.0, %v108_v0  ;;  %s442_s19 = scalar_lea.hbm %s483_s1, %s191_s13 }
  0x35   : > { %s107_s5 = scalar_lea.vmem [#allocation5], %s189_s4  ;;  %s112_s20 = scalar_lea.sflag [#allocation4], %s105_s3 }
  0x36   : > { %s125_s11 = sshll.u32 %s107_s5, 4  ;;  %110 = vst [vmem:[%s107_s5] sm:$0xff] %v109_v1  ;;  %p494_p6 = scmp.ne.s32.totalorder %s487_s16, 0  ;;  %s437_s11 = int_to_ptr.vmem [resolvable:$true] %s125_s11 }
  0x37   : > { %s272_s21 = scalar_lea.vmem %s437_s11, 128  ;;  %s341_s10 = smov [#allocation5]  }
  0x38   : > { %p273_p5 = scmp.ne.s32.totalorder %s437_s11, %s272_s21  ;;  %s276_s22 = sshll.u32 %s341_s10, 4  ;;  %s277_s22 = int_to_ptr.vmem [resolvable:$false] %s276_s22 }
  0x39   : > { %s278_s23 = scalar_lea.vmem %s277_s22, 256  ;;  %p279_p12 = scmp.lt.s32.totalorder %s437_s11, %s277_s22 }
  0x3a   : > { %p274_p9 = pnand %p273_p5, %p494_p6  ;;  %p280_p2 = scmp.lt.s32.totalorder %s278_s23, %s272_s21 }
  0x3c   : > { %p275_p10 = pneg %p274_p9  ;;  %p281_p3 = por %p280_p2, %p279_p12 }
  0x3e   : > { %p282_p4 = pnand %p281_p3, %p275_p10 }
  0x40   : > { %285 = shalt.err (!%p282_p4)
}
  0x41   : > { %s286_s24 = scalar_lea.hbm %s442_s19, 128  ;;  %s290_s27 = scalar_lea.hbm %s483_s1, 256 }
  0x42   : > { %p287_p7 = scmp.ne.s32.totalorder %s442_s19, %s286_s24  ;;  %p291_p13 = scmp.lt.u32.totalorder %s442_s19, %s483_s1 }
  0x43   : > { %p292_p1 = scmp.lt.u32.totalorder %s290_s27, %s286_s24  ;;  %p294_p5 = scmp.lt.u32.totalorder %s286_s24, %s442_s19 }
  0x44   : > { %p288_p8 = pnand %p287_p7, %p494_p6 }
  0x45   : > { %p293_p0 = por %p292_p1, %p291_p13 }
  0x46   : > { %p289_p11 = pneg %p288_p8 }
  0x47   : > { %p295_p9 = por %p294_p5, %p293_p0 }
  0x49   : > { %p296_p10 = pnand %p295_p9, %p289_p11 }
  0x4b   : > { %299 = shalt.err (!%p296_p10)
}
  0x4c   : > { %198 = dma.vmem_to_hbm [thread:$0]  (%p494_p6), %s437_s11, 128, %s442_s19, %s112_s20  }
  0x4d PF: > { %p210_p12 = scmp.ge.s32.totalorder %s338_s9, 2  ;;  %s137_s30 = sand.u32 1, %s326_s6  }
  0x4e   : > { %p495_p2 = scmp.ne.s32.totalorder %s488_s17, 0  ;;  %s138_s2 = scalar_lea.sflag [#allocation4], %s137_s30 }
  0x50   : > { %p205_p3 = pnand %p210_p12, %p495_p2 }
  0x52   : > { %321 = dma.done.wait (!%p205_p3), %s138_s2, 128  }
  0x53   : > { %323 = vsyncadd (!%p205_p3), %s138_s2, 4294967168  ;;  %p12_p4 = scmp.ge.s32.totalorder %s377_s12, 4   ;;  %s496_s6 = smov %s330_s7 }
  0x54   : > { %s497_s7 = smov %s334_s8  ;;  %s498_s8 = smov %s388_s15 }
  0x55   : > { %s499_s9 = smov %s377_s12  ;;  %14 = sbr.rel (!%p12_p4) target bundleno = 4 (0x4), region = 61 }
  0x5c   :  { %143 = vsyncpa [#allocation3], 1 }
  0x5d   :  { %145 = vsyncpa [#allocation3 + $0x1], 1 }
  0x5e   :  { %146 = vsyncpa [#allocation4], 1 }
  0x5f   :  { %148 = vsyncpa [#allocation4 + $0x1], 1 }

// kernel: _lambda_.2
= control target key start
LH: loop header
LB: loop body
LE: loop exit
PB: predicated region body
PF: predicated region fallthrough
CT: control target
= control target key end

     0   :  { %v1919_v0 = vmov 0.0   ;;  %vm1920_vm0 = vmmov 0   ;;  %vm89_vm1 = vcmask 261120   ;;  %s2330_s2 = inlined_call_operand.vmem [shape: bf16[3,32,32], index: 2, kind: input, shape index: {}]   ;;  %s2331_s0 = inlined_call_operand.vmem [shape: bf16[4,16,32], index: 0, kind: input, shape index: {}]   ;;  %s2332_s3 = inlined_call_operand.vmem [shape: bf16[3,32,32], index: 3, kind: input, shape index: {}]   ;;  %s2333_s1 = inlined_call_operand.vmem [shape: f32[16,32], index: 1, kind: input, shape index: {}]   ;;  %s2334_s5 = inlined_call_operand.vmem [shape: f32[3,1,32], index: 5, kind: input, shape index: {}]   ;;  %s2335_s4 = inlined_call_operand.vmem [shape: f32[3,1,32], index: 4, kind: input, shape index: {}]   ;;  %s2336_s6 = inlined_call_operand.vmem [shape: f32[4,16,32], index: 6, kind: output, shape index: {}]  }
   0x1   :  { %1565 = vmatprep.subr.bf16.mxu0 %v1919_v0  ;;  %v1960_v1 = vld [vmem:[%s2330_s2] sm:$0xff]   ;;  %1573 = vmatprep.subr.bf16.mxu1 %v1919_v0  ;;  %v1966_v2 = vld [vmem:[%s2330_s2 + $0x10] sm:$0xff]   ;;  %v1976_v3 = vld [vmem:[%s2330_s2 + $0x8] sm:$0xff]  }
   0x2   :  { %1569 = vmatprep.mubr.msk.bf16.mxu0 %vm1920_vm0, %v1919_v0  ;;  %1577 = vmatprep.mubr.msk.bf16.mxu1 %vm1920_vm0, %v1919_v0  ;;  %v1984_v4 = vld [vmem:[%s2330_s2 + $0x18] sm:$0xff]   ;;  %v1826_v5 = vld [vmem:[%s2331_s0] sm:$0xff]   ;;  %v2001_v7 = vld [vmem:[%s2332_s3 + $0x10] sm:$0xff]  }
   0x3   :  { %1566 = vmatpush3.bf16.msra.mxu0 %v1960_v1  ;;  %1574 = vmatpush3.bf16.msra.mxu1 %v1966_v2  ;;  %v1993_v6 = vld [vmem:[%s2330_s2 + $0x20] sm:$0xff]   ;;  %v2009_v8 = vld [vmem:[%s2330_s2 + $0x28] sm:$0xff]   ;;  %v2018_v9 = vld [vmem:[%s2332_s3 + $0x18] sm:$0xff]  }
   0x4   :  { %1567 = vmatprep.subr.bf16.mxu0 %v1919_v0  ;;  %1575 = vmatprep.subr.bf16.mxu1 %v1919_v0  ;;  %v2027_v10 = vld [vmem:[%s2332_s3] sm:$0xff]   ;;  %v2038_v12 = vld [vmem:[%s2333_s1 + $0x8] sm:$0xff] }
   0x5   :  { %v2032_v11 = vld [vmem:[%s2333_s1] sm:$0xff]  ;;  %v2047_v13 = vld [vmem:[%s2332_s3 + $0x8] sm:$0xff]  }
   0x6   :  { %v252_v14 = vpack.c.bf16 %v2038_v12, %v2032_v11  ;;  %v2057_v15 = vld [vmem:[%s2332_s3 + $0x20] sm:$0xff]   ;;  %v2065_v16 = vld [vmem:[%s2332_s3 + $0x28] sm:$0xff]  }
   0x7   :  { %1568 = vmatpush3.bf16.msra.mxu0 %v1976_v3  ;;  %1576 = vmatpush3.bf16.msra.mxu1 %v1984_v4  ;;  %v1836_v17 = vld [vmem:[%s2331_s0 + $0x8] sm:$0xff]   ;;  %v1419_v20 = vld [vmem:[%s2335_s4] ss:$0 sm:$0xff]  ;;  %v1424_v24 = vld [vmem:[%s2335_s4 + $0x1] ss:$0 sm:$0xff] }
   0x8   :  { %1581 = vmatprep.subr.bf16.mxu0 %v1919_v0  ;;  %1597 = vmatprep.subr.bf16.mxu1 %v1919_v0  ;;  %v1432_v21 = vld [vmem:[%s2334_s5] ss:$0 sm:$0xff]  ;;  %v1436_v25 = vld [vmem:[%s2334_s5 + $0x1] ss:$0 sm:$0xff]  ;;  %v2134_v53 = vld [vmem:[%s2334_s5 + $0x2] ss:$0 sm:$0xff] }
   0x9   :  { %v2123_v26 = vadd.f32 %v1432_v21, %v1419_v20  ;;  %v2125_v30 = vadd.f32 %v1436_v25, %v1424_v24  ;;  %v2140_v57 = vld [vmem:[%s2335_s4 + $0x2] ss:$0 sm:$0xff] }
   0xa   :  { %1570 = vmatmul.mubr.msk.bf16.vlgmr.msra.gmra.mrb[0].mxu0 %vm89_vm1, %v1826_v5  ;;  %1578 = vmatmul.mubr.msk.bf16.vlgmr.msra.gmra.mrb[0].mxu1 %vm89_vm1, %v1826_v5 }
   0xb   :  { %1582 = vmatpush3.bf16.msra.mxu0 %v1993_v6  ;;  %1585 = vmatprep.mubr.msk.bf16.mxu0 %vm1920_vm0, %v1919_v0 }
   0xc   :  { %1583 = vmatprep.subr.bf16.mxu0 %v1919_v0  ;;  %1598 = vmatpush3.bf16.msra.mxu1 %v2001_v7 }
   0xd   :  { %1601 = vmatprep.mubr.msk.bf16.mxu1 %vm1920_vm0, %v1919_v0  ;;  %1599 = vmatprep.subr.bf16.mxu1 %v1919_v0 }
   0xf   :  { %1584 = vmatpush3.bf16.msra.mxu0 %v2009_v8 }
  0x10   :  { %1589 = vmatprep.subr.bf16.mxu0 %v1919_v0  ;;  %1600 = vmatpush3.bf16.msra.mxu1 %v2018_v9 }
  0x11   :  { %1605 = vmatprep.subr.bf16.mxu1 %v1919_v0 }
  0x12   :  { %1586 = vmatmul.mubr.msk.bf16.vlgmr.msra.gmra.mrb[4].mxu0 %vm89_vm1, %v1826_v5 }
  0x13   :  { %1590 = vmatpush3.bf16.msra.mxu0 %v2027_v10  ;;  %1593 = vmatprep.mubr.msk.bf16.mxu0 %vm1920_vm0, %v1919_v0 }
  0x14   :  { %1591 = vmatprep.subr.bf16.mxu0 %v1919_v0 }
  0x16   :  { %1602 = vmatmul.mubr.msk.bf16.vlgmr.msra.gmra.mrb[0].mxu1 %vm89_vm1, %v252_v14 }
  0x17   :  { %1592 = vmatpush3.bf16.msra.mxu0 %v2047_v13  ;;  %1606 = vmatpush3.bf16.msra.mxu1 %v2057_v15 }
  0x18   :  { %1609 = vmatprep.mubr.msk.bf16.mxu1 %vm1920_vm0, %v1919_v0  ;;  %1607 = vmatprep.subr.bf16.mxu1 %v1919_v0 }
  0x19   :  { %1613 = vmatprep.subr.bf16.mxu0 %v1919_v0 }
  0x1a   :  { %1594 = vmatmul.mubr.msk.bf16.vlgmr.msra.gmra.mrb[0].mxu0 %vm89_vm1, %v252_v14 }
  0x1b   :  { %1614 = vmatpush3.bf16.msra.mxu0 %v1960_v1  ;;  %1617 = vmatprep.mubr.msk.bf16.mxu0 %vm1920_vm0, %v1919_v0 }
  0x1c   :  { %1608 = vmatpush3.bf16.msra.mxu1 %v2065_v16  ;;  %1615 = vmatprep.subr.bf16.mxu0 %v1919_v0 }
  0x1d   :  { %1621 = vmatprep.subr.bf16.mxu1 %v1919_v0 }
  0x1f   :  { %1610 = vmatmul.mubr.msk.bf16.vlgmr.msra.gmra.mrb[4].mxu1 %vm89_vm1, %v252_v14  ;;  %1616 = vmatpush3.bf16.msra.mxu0 %v1976_v3 }
  0x20   :  { %1622 = vmatpush3.bf16.msra.mxu1 %v1966_v2  ;;  %1629 = vmatprep.subr.bf16.mxu0 %v1919_v0 }
  0x21   :  { %1623 = vmatprep.subr.bf16.mxu1 %v1919_v0  ;;  %1625 = vmatprep.mubr.msk.bf16.mxu1 %vm1920_vm0, %v1919_v0 }
  0x22   :  { %1618 = vmatmul.mubr.msk.bf16.vlgmr.msra.gmra.mrb[8].mxu0 %vm89_vm1, %v1836_v17 }
  0x23   :  { %1630 = vmatpush3.bf16.msra.mxu0 %v1993_v6  ;;  %1633 = vmatprep.mubr.msk.bf16.mxu0 %vm1920_vm0, %v1919_v0 }
  0x24   :  { %1624 = vmatpush3.bf16.msra.mxu1 %v1984_v4  ;;  %1631 = vmatprep.subr.bf16.mxu0 %v1919_v0 }
  0x25   :  { %1645 = vmatprep.subr.bf16.mxu1 %v1919_v0 }
  0x27   :  { %1626 = vmatmul.mubr.msk.bf16.vlgmr.msra.gmra.mrb[8].mxu1 %vm89_vm1, %v1836_v17  ;;  %1632 = vmatpush3.bf16.msra.mxu0 %v2009_v8 }
  0x28   :  { %1646 = vmatpush3.bf16.msra.mxu1 %v2001_v7  ;;  %1649 = vmatprep.mubr.msk.bf16.mxu1 %vm1920_vm0, %v1919_v0 }
  0x29   :  { %1647 = vmatprep.subr.bf16.mxu1 %v1919_v0  ;;  %1637 = vmatprep.subr.bf16.mxu0 %v1919_v0 }
  0x2a   :  { %1634 = vmatmul.mubr.msk.bf16.vlgmr.msra.gmra.mrb[12].mxu0 %vm89_vm1, %v1836_v17 }
  0x2b   :  { %1638 = vmatpush3.bf16.msra.mxu0 %v2027_v10  ;;  %1641 = vmatprep.mubr.msk.bf16.mxu0 %vm1920_vm0, %v1919_v0 }
  0x2c   :  { %1648 = vmatpush3.bf16.msra.mxu1 %v2018_v9  ;;  %1639 = vmatprep.subr.bf16.mxu0 %v1919_v0 }
  0x2d   :  { %1653 = vmatprep.subr.bf16.mxu1 %v1919_v0 }
  0x2f   :  { %1640 = vmatpush3.bf16.msra.mxu0 %v2047_v13 }
  0x30   :  { %1661 = vmatprep.subr.bf16.mxu0 %v1919_v0 }
  0xe5   :  { %v245_v18 = vpop.f32.mrb[4].mxu0 }
  0xe6   :  { %v1587_v19 = vpop.f32.mrb[5].mxu0  ;;  %v246_v60 = vadd.f32 %v2140_v57, %v245_v18 }
  0xe7   :  { %v248_v22 = vpop.f32.mrb[6].mxu0 }
  0xe8   :  { %v1588_v23 = vpop.f32.mrb[7].mxu0  ;;  %v249_v5 = vadd.f32 %v2140_v57, %v248_v22 }
  0xe9   :  { %v367_v27 = vpop.f32.mrb[0].mxu1 }
  0xea   :  { %v1603_v28 = vpop.f32.mrb[1].mxu1  ;;  %v1762_v39 = vadd.f32 %v2125_v30, %v367_v27 }
  0xeb   :  { %v370_v29 = vpop.f32.mrb[2].mxu1 }
  0xec   :  { %v1604_v32 = vpop.f32.mrb[3].mxu1  ;;  %v1764_v42 = vadd.f32 %v2125_v30, %v370_v29  ;;  %v1446_v45 = vmul.f32 -1.442695, %v1762_v39 }
  0xed   :  { %v308_v31 = vpop.f32.mrb[0].mxu0 }
  0xee   :  { %v1758_v33 = vadd.f32 %v2123_v26, %v308_v31  ;;  %v1595_v34 = vpop.f32.mrb[1].mxu0  ;;  %v1447_v47 = vmul.f32 -1.442695, %v1764_v42 }
  0xef   :  { %v311_v35 = vpop.f32.mrb[2].mxu0 }
  0xf0   :  { %v1444_v36 = vmul.f32 -1.442695, %v1758_v33  ;;  %v1760_v37 = vadd.f32 %v2123_v26, %v311_v35  ;;  %v1596_v38 = vpop.f32.mrb[3].mxu0 }
  0xf2   :  { %1839 = vpow2.f32 %v1444_v36  ;;  %v1445_v40 = vmul.f32 -1.442695, %v1760_v37  ;;  %v426_v41 = vpop.f32.mrb[4].mxu1  ;;  %v1837_v36 = vld [vmem:[%s2331_s0 + $0x10] sm:$0xff]  }
  0xf3   :  { %v1611_v43 = vpop.f32.mrb[5].mxu1  ;;  %v427_v56 = vadd.f32 %v2134_v53, %v426_v41 }
  0xf4   :  { %1841 = vpow2.f32 %v1445_v40  ;;  %v429_v44 = vpop.f32.mrb[6].mxu1 }
  0xf5   :  { %v1612_v46 = vpop.f32.mrb[7].mxu1  ;;  %1843 = vpow2.f32 %v1446_v45  ;;  %v430_v62 = vadd.f32 %v2134_v53, %v429_v44 }
  0xf6   :  { %1845 = vpow2.f32 %v1447_v47 }
  0xfc   :  { %v1840_v48 = vpop.eup %1839 }
  0xfd   :  { %v441_v49 = vadd.f32 1.0, %v1840_v48 }
  0xfe   :  { %v1842_v50 = vpop.eup %1841 }
  0xff   :  { %1847 = vrcp.f32 %v441_v49  ;;  %v442_v51 = vadd.f32 1.0, %v1842_v50  ;;  %v1844_v52 = vpop.eup %1843 }
 0x100   :  { %v1846_v54 = vpop.eup %1845  ;;  %v455_v55 = vadd.f32 1.0, %v1844_v52 }
 0x101   :  { %1849 = vrcp.f32 %v442_v51  ;;  %v456_v58 = vadd.f32 1.0, %v1846_v54 }
 0x102   :  { %1851 = vrcp.f32 %v455_v55 }
 0x103   :  { %1853 = vrcp.f32 %v456_v58 }
 0x109   :  { %v1848_v59 = vpop.eup %1847 }
 0x10a   :  { %v461_v61 = vmul.f32 %v1848_v59, %v427_v56 }
 0x10b   :  { %v1850_v63 = vpop.eup %1849 }
 0x10c   :  { %v463_v14 = vadd.f32 %v461_v61, %v246_v60  ;;  %v462_v17 = vmul.f32 %v1850_v63, %v430_v62  ;;  %v1852_v20 = vpop.eup %1851 }
 0x10d   :  { %v1854_v21 = vpop.eup %1853  ;;  %v467_v23 = vsub.f32 1.0, %v1852_v20  ;;  %v471_v25 = vmul.f32 %v1852_v20, %v2032_v11 }
 0x10e   :  { %1855 = vtanh.f32 %v463_v14  ;;  %v464_v19 = vadd.f32 %v462_v17, %v249_v5  ;;  %v468_v18 = vsub.f32 1.0, %v1854_v21  ;;  %v472_v29 = vmul.f32 %v1854_v21, %v2038_v12  ;;  %v604_v12 = vpop.f32.mrb[12].mxu0 }
 0x10f   :  { %v1635_v33 = vpop.f32.mrb[13].mxu0  ;;  %v605_v21 = vadd.f32 %v2140_v57, %v604_v12 }
 0x110   :  { %1857 = vtanh.f32 %v464_v19  ;;  %v607_v34 = vpop.f32.mrb[14].mxu0 }
 0x111   :  { %v1636_v35 = vpop.f32.mrb[15].mxu0 }
 0x118   :  { %v1856_v24 = vpop.eup %1855 }
 0x119   :  { %v469_v27 = vmul.f32 %v1856_v24, %v467_v23 }
 0x11a   :  { %v1858_v28 = vpop.eup %1857 }
 0x11b   :  { %v470_v31 = vmul.f32 %v1858_v28, %v468_v18  ;;  %v2147_v32 = vadd.f32 %v471_v25, %v469_v27  ;;  %v608_v18 = vadd.f32 %v2140_v57, %v607_v34 }
 0x11d   :  { %v2149_v22 = vadd.f32 %v472_v29, %v470_v31  ;;  %475 = vst.msk [vmem:[%s2336_s6] sm:$0xff] %vm89_vm1, %v2147_v32 }
 0x11f   :  { %476 = vst.msk [vmem:[%s2336_s6 + $0x8] sm:$0xff] %vm89_vm1, %v2149_v22  ;;  %v611_v11 = vpack.c.bf16 %v2149_v22, %v2147_v32 }
 0x121   :  { %1642 = vmatmul.mubr.msk.bf16.vlgmr.msra.gmra.mrb[8].mxu0 %vm89_vm1, %v611_v11  ;;  %1650 = vmatmul.mubr.msk.bf16.vlgmr.msra.gmra.mrb[8].mxu1 %vm89_vm1, %v611_v11 }
 0x122   :  { %1654 = vmatpush3.bf16.msra.mxu1 %v2057_v15  ;;  %1657 = vmatprep.mubr.msk.bf16.mxu1 %vm1920_vm0, %v1919_v0 }
 0x123   :  { %1655 = vmatprep.subr.bf16.mxu1 %v1919_v0  ;;  %1662 = vmatpush3.bf16.msra.mxu0 %v1960_v1 }
 0x124   :  { %1663 = vmatprep.subr.bf16.mxu0 %v1919_v0  ;;  %1665 = vmatprep.mubr.msk.bf16.mxu0 %vm1920_vm0, %v1919_v0 }
 0x126   :  { %1656 = vmatpush3.bf16.msra.mxu1 %v2065_v16 }
 0x127   :  { %1664 = vmatpush3.bf16.msra.mxu0 %v1976_v3  ;;  %1669 = vmatprep.subr.bf16.mxu1 %v1919_v0 }
 0x128   :  { %1677 = vmatprep.subr.bf16.mxu0 %v1919_v0 }
 0x129   :  { %1658 = vmatmul.mubr.msk.bf16.vlgmr.msra.gmra.mrb[12].mxu1 %vm89_vm1, %v611_v11 }
 0x12a   :  { %1670 = vmatpush3.bf16.msra.mxu1 %v1966_v2  ;;  %1673 = vmatprep.mubr.msk.bf16.mxu1 %vm1920_vm0, %v1919_v0 }
 0x12b   :  { %1671 = vmatprep.subr.bf16.mxu1 %v1919_v0  ;;  %1666 = vmatmul.mubr.msk.bf16.vlgmr.msra.gmra.mrb[16].mxu0 %vm89_vm1, %v1837_v36 }
 0x12c   :  { %1678 = vmatpush3.bf16.msra.mxu0 %v1993_v6  ;;  %1681 = vmatprep.mubr.msk.bf16.mxu0 %vm1920_vm0, %v1919_v0 }
 0x12d   :  { %1679 = vmatprep.subr.bf16.mxu0 %v1919_v0 }
 0x12e   :  { %1672 = vmatpush3.bf16.msra.mxu1 %v1984_v4 }
 0x12f   :  { %1693 = vmatprep.subr.bf16.mxu1 %v1919_v0 }
 0x130   :  { %1680 = vmatpush3.bf16.msra.mxu0 %v2009_v8 }
 0x131   :  { %1674 = vmatmul.mubr.msk.bf16.vlgmr.msra.gmra.mrb[16].mxu1 %vm89_vm1, %v1837_v36  ;;  %1685 = vmatprep.subr.bf16.mxu0 %v1919_v0 }
 0x132   :  { %1694 = vmatpush3.bf16.msra.mxu1 %v2001_v7  ;;  %1697 = vmatprep.mubr.msk.bf16.mxu1 %vm1920_vm0, %v1919_v0 }
 0x133   :  { %1695 = vmatprep.subr.bf16.mxu1 %v1919_v0  ;;  %1682 = vmatmul.mubr.msk.bf16.vlgmr.msra.gmra.mrb[20].mxu0 %vm89_vm1, %v1837_v36 }
 0x134   :  { %1686 = vmatpush3.bf16.msra.mxu0 %v2027_v10  ;;  %1689 = vmatprep.mubr.msk.bf16.mxu0 %vm1920_vm0, %v1919_v0 }
 0x135   :  { %1687 = vmatprep.subr.bf16.mxu0 %v1919_v0 }
 0x136   :  { %1696 = vmatpush3.bf16.msra.mxu1 %v2018_v9 }
 0x137   :  { %1701 = vmatprep.subr.bf16.mxu1 %v1919_v0 }
 0x138   :  { %1688 = vmatpush3.bf16.msra.mxu0 %v2047_v13 }
 0x139   :  { %1709 = vmatprep.subr.bf16.mxu0 %v1919_v0 }
 0x1f4   :  { %v649_v37 = vpop.f32.mrb[8].mxu0  ;;  %v690_v38 = vpop.f32.mrb[8].mxu1 }
 0x1f5   :  { %v1766_v39 = vadd.f32 %v2123_v26, %v649_v37  ;;  %v1643_v40 = vpop.f32.mrb[9].mxu0  ;;  %v1651_v41 = vpop.f32.mrb[9].mxu1  ;;  %v1770_v48 = vadd.f32 %v2125_v30, %v690_v38 }
 0x1f6   :  { %v652_v42 = vpop.f32.mrb[10].mxu0  ;;  %v693_v43 = vpop.f32.mrb[10].mxu1 }
 0x1f7   :  { %v1457_v44 = vmul.f32 -1.442695, %v1766_v39  ;;  %v1768_v45 = vadd.f32 %v2123_v26, %v652_v42  ;;  %v1644_v46 = vpop.f32.mrb[11].mxu0  ;;  %v1652_v47 = vpop.f32.mrb[11].mxu1  ;;  %v1772_v50 = vadd.f32 %v2125_v30, %v693_v43  ;;  %v1459_v51 = vmul.f32 -1.442695, %v1770_v48 }
 0x1f8   :  { %v1838_v43 = vld [vmem:[%s2331_s0 + $0x18] sm:$0xff]  }
 0x1f9   :  { %1859 = vpow2.f32 %v1457_v44  ;;  %v1458_v49 = vmul.f32 -1.442695, %v1768_v45  ;;  %v1460_v55 = vmul.f32 -1.442695, %v1772_v50 }
 0x1fb   :  { %1861 = vpow2.f32 %v1458_v49 }
 0x1fc   :  { %v731_v52 = vpop.f32.mrb[12].mxu1  ;;  %1863 = vpow2.f32 %v1459_v51 }
 0x1fd   :  { %v1659_v54 = vpop.f32.mrb[13].mxu1  ;;  %1865 = vpow2.f32 %v1460_v55  ;;  %v732_v19 = vadd.f32 %v2134_v53, %v731_v52 }
 0x1fe   :  { %v734_v56 = vpop.f32.mrb[14].mxu1 }
 0x1ff   :  { %v1660_v58 = vpop.f32.mrb[15].mxu1  ;;  %v735_v24 = vadd.f32 %v2134_v53, %v734_v56 }
 0x203   :  { %v1860_v59 = vpop.eup %1859 }
 0x204   :  { %v746_v60 = vadd.f32 1.0, %v1860_v59 }
 0x205   :  { %v1862_v61 = vpop.eup %1861 }
 0x206   :  { %1867 = vrcp.f32 %v746_v60  ;;  %v747_v62 = vadd.f32 1.0, %v1862_v61  ;;  %v1864_v63 = vpop.eup %1863 }
 0x207   :  { %v1866_v5 = vpop.eup %1865  ;;  %v760_v14 = vadd.f32 1.0, %v1864_v63 }
 0x208   :  { %1869 = vrcp.f32 %v747_v62  ;;  %v761_v17 = vadd.f32 1.0, %v1866_v5 }
 0x209   :  { %1871 = vrcp.f32 %v760_v14 }
 0x20a   :  { %1873 = vrcp.f32 %v761_v17 }
 0x210   :  { %v1868_v20 = vpop.eup %1867 }
 0x211   :  { %v766_v23 = vmul.f32 %v1868_v20, %v732_v19 }
 0x212   :  { %v1870_v25 = vpop.eup %1869 }
 0x213   :  { %v768_v27 = vadd.f32 %v766_v23, %v605_v21  ;;  %v767_v28 = vmul.f32 %v1870_v25, %v735_v24  ;;  %v1872_v31 = vpop.eup %1871 }
 0x214   :  { %v1874_v11 = vpop.eup %1873  ;;  %v772_v33 = vsub.f32 1.0, %v1872_v31  ;;  %v776_v36 = vmul.f32 %v1872_v31, %v2147_v32 }
 0x215   :  { %1875 = vtanh.f32 %v768_v27  ;;  %v769_v29 = vadd.f32 %v767_v28, %v608_v18  ;;  %v773_v12 = vsub.f32 1.0, %v1874_v11  ;;  %v777_v39 = vmul.f32 %v1874_v11, %v2149_v22 }
 0x217   :  { %1877 = vtanh.f32 %v769_v29 }
 0x21f   :  { %v1876_v35 = vpop.eup %1875 }
 0x220   :  { %v774_v37 = vmul.f32 %v1876_v35, %v772_v33 }
 0x221   :  { %v1878_v38 = vpop.eup %1877 }
 0x222   :  { %v775_v40 = vmul.f32 %v1878_v38, %v773_v12  ;;  %v2218_v41 = vadd.f32 %v776_v36, %v774_v37 }
 0x224   :  { %v2220_v34 = vadd.f32 %v777_v39, %v775_v40  ;;  %1461 = vst.msk [vmem:[%s2336_s6 + $0x10] sm:$0xff] %vm89_vm1, %v2218_v41 }
 0x226   :  { %1462 = vst.msk [vmem:[%s2336_s6 + $0x18] sm:$0xff] %vm89_vm1, %v2220_v34  ;;  %v917_v32 = vpack.c.bf16 %v2220_v34, %v2218_v41 }
 0x228   :  { %1690 = vmatmul.mubr.msk.bf16.vlgmr.msra.gmra.mrb[16].mxu0 %vm89_vm1, %v917_v32  ;;  %1698 = vmatmul.mubr.msk.bf16.vlgmr.msra.gmra.mrb[16].mxu1 %vm89_vm1, %v917_v32 }
 0x229   :  { %1702 = vmatpush3.bf16.msra.mxu1 %v2057_v15  ;;  %1705 = vmatprep.mubr.msk.bf16.mxu1 %vm1920_vm0, %v1919_v0 }
 0x22a   :  { %1703 = vmatprep.subr.bf16.mxu1 %v1919_v0  ;;  %1710 = vmatpush3.bf16.msra.mxu0 %v1960_v1  ;;  %v910_v1 = vpop.f32.mrb[20].mxu0 }
 0x22b   :  { %1711 = vmatprep.subr.bf16.mxu0 %v1919_v0  ;;  %1713 = vmatprep.mubr.msk.bf16.mxu0 %vm1920_vm0, %v1919_v0  ;;  %v1683_v22 = vpop.f32.mrb[21].mxu0  ;;  %v911_v20 = vadd.f32 %v2140_v57, %v910_v1 }
 0x22d   :  { %1704 = vmatpush3.bf16.msra.mxu1 %v2065_v16 }
 0x22e   :  { %1712 = vmatpush3.bf16.msra.mxu0 %v1976_v3  ;;  %1717 = vmatprep.subr.bf16.mxu1 %v1919_v0  ;;  %v913_v3 = vpop.f32.mrb[22].mxu0 }
 0x22f   :  { %1725 = vmatprep.subr.bf16.mxu0 %v1919_v0  ;;  %v1684_v42 = vpop.f32.mrb[23].mxu0  ;;  %v914_v25 = vadd.f32 %v2140_v57, %v913_v3 }
 0x230   :  { %1706 = vmatmul.mubr.msk.bf16.vlgmr.msra.gmra.mrb[20].mxu1 %vm89_vm1, %v917_v32 }
 0x231   :  { %1718 = vmatpush3.bf16.msra.mxu1 %v1966_v2  ;;  %1721 = vmatprep.mubr.msk.bf16.mxu1 %vm1920_vm0, %v1919_v0 }
 0x232   :  { %1719 = vmatprep.subr.bf16.mxu1 %v1919_v0  ;;  %1714 = vmatmul.mubr.msk.bf16.vlgmr.msra.gmra.mrb[24].mxu0 %vm89_vm1, %v1838_v43 }
 0x233   :  { %1726 = vmatpush3.bf16.msra.mxu0 %v1993_v6  ;;  %1729 = vmatprep.mubr.msk.bf16.mxu0 %vm1920_vm0, %v1919_v0 }
 0x234   :  { %1727 = vmatprep.subr.bf16.mxu0 %v1919_v0 }
 0x235   :  { %1720 = vmatpush3.bf16.msra.mxu1 %v1984_v4 }
 0x236   :  { %1741 = vmatprep.subr.bf16.mxu1 %v1919_v0 }
 0x237   :  { %1728 = vmatpush3.bf16.msra.mxu0 %v2009_v8 }
 0x238   :  { %1722 = vmatmul.mubr.msk.bf16.vlgmr.msra.gmra.mrb[24].mxu1 %vm89_vm1, %v1838_v43  ;;  %1733 = vmatprep.subr.bf16.mxu0 %v1919_v0 }
 0x239   :  { %1742 = vmatpush3.bf16.msra.mxu1 %v2001_v7  ;;  %1745 = vmatprep.mubr.msk.bf16.mxu1 %vm1920_vm0, %v1919_v0 }
 0x23a   :  { %1743 = vmatprep.subr.bf16.mxu1 %v1919_v0  ;;  %1730 = vmatmul.mubr.msk.bf16.vlgmr.msra.gmra.mrb[28].mxu0 %vm89_vm1, %v1838_v43 }
 0x23b   :  { %1734 = vmatpush3.bf16.msra.mxu0 %v2027_v10  ;;  %1737 = vmatprep.mubr.msk.bf16.mxu0 %vm1920_vm0, %v1919_v0 }
 0x23c   :  { %1735 = vmatprep.subr.bf16.mxu0 %v1919_v0 }
 0x23d   :  { %1744 = vmatpush3.bf16.msra.mxu1 %v2018_v9 }
 0x23e   :  { %1749 = vmatprep.subr.bf16.mxu1 %v1919_v0 }
 0x23f   :  { %1736 = vmatpush3.bf16.msra.mxu0 %v2047_v13 }
 0x2fb   :  { %v955_v2 = vpop.f32.mrb[16].mxu0  ;;  %v996_v4 = vpop.f32.mrb[16].mxu1 }
 0x2fc   :  { %v1774_v6 = vadd.f32 %v2123_v26, %v955_v2  ;;  %v1691_v7 = vpop.f32.mrb[17].mxu0  ;;  %v1699_v8 = vpop.f32.mrb[17].mxu1  ;;  %v1778_v48 = vadd.f32 %v2125_v30, %v996_v4 }
 0x2fd   :  { %v958_v9 = vpop.f32.mrb[18].mxu0  ;;  %v999_v44 = vpop.f32.mrb[18].mxu1 }
 0x2fe   :  { %v1472_v45 = vmul.f32 -1.442695, %v1774_v6  ;;  %v1776_v46 = vadd.f32 %v2123_v26, %v958_v9  ;;  %v1692_v47 = vpop.f32.mrb[19].mxu0  ;;  %v1700_v10 = vpop.f32.mrb[19].mxu1  ;;  %v1780_v50 = vadd.f32 %v2125_v30, %v999_v44  ;;  %v1474_v13 = vmul.f32 -1.442695, %v1778_v48 }
 0x300   :  { %1879 = vpow2.f32 %v1472_v45  ;;  %v1473_v49 = vmul.f32 -1.442695, %v1776_v46  ;;  %v1475_v54 = vmul.f32 -1.442695, %v1780_v50 }
 0x302   :  { %1881 = vpow2.f32 %v1473_v49 }
 0x303   :  { %v1037_v51 = vpop.f32.mrb[20].mxu1  ;;  %1883 = vpow2.f32 %v1474_v13 }
 0x304   :  { %v1707_v52 = vpop.f32.mrb[21].mxu1  ;;  %1885 = vpow2.f32 %v1475_v54  ;;  %v1038_v17 = vadd.f32 %v2134_v53, %v1037_v51 }
 0x305   :  { %v1040_v55 = vpop.f32.mrb[22].mxu1 }
 0x306   :  { %v1708_v56 = vpop.f32.mrb[23].mxu1  ;;  %v1041_v23 = vadd.f32 %v2134_v53, %v1040_v55 }
 0x30a   :  { %v1880_v58 = vpop.eup %1879 }
 0x30b   :  { %v1052_v59 = vadd.f32 1.0, %v1880_v58 }
 0x30c   :  { %v1882_v60 = vpop.eup %1881 }
 0x30d   :  { %1887 = vrcp.f32 %v1052_v59  ;;  %v1053_v61 = vadd.f32 1.0, %v1882_v60  ;;  %v1884_v62 = vpop.eup %1883 }
 0x30e   :  { %v1886_v63 = vpop.eup %1885  ;;  %v1066_v5 = vadd.f32 1.0, %v1884_v62 }
 0x30f   :  { %1889 = vrcp.f32 %v1053_v61  ;;  %v1067_v14 = vadd.f32 1.0, %v1886_v63 }
 0x310   :  { %1891 = vrcp.f32 %v1066_v5 }
 0x311   :  { %1893 = vrcp.f32 %v1067_v14 }
 0x317   :  { %v1888_v19 = vpop.eup %1887 }
 0x318   :  { %v1072_v21 = vmul.f32 %v1888_v19, %v1038_v17 }
 0x319   :  { %v1890_v24 = vpop.eup %1889 }
 0x31a   :  { %v1074_v18 = vadd.f32 %v1072_v21, %v911_v20  ;;  %v1073_v27 = vmul.f32 %v1890_v24, %v1041_v23  ;;  %v1892_v29 = vpop.eup %1891 }
 0x31b   :  { %v1894_v31 = vpop.eup %1893  ;;  %v1078_v11 = vsub.f32 1.0, %v1892_v29  ;;  %v1082_v35 = vmul.f32 %v1892_v29, %v2218_v41 }
 0x31c   :  { %1895 = vtanh.f32 %v1074_v18  ;;  %v1075_v28 = vadd.f32 %v1073_v27, %v914_v25  ;;  %v1079_v36 = vsub.f32 1.0, %v1894_v31  ;;  %v1083_v38 = vmul.f32 %v1894_v31, %v2220_v34  ;;  %v1216_v34 = vpop.f32.mrb[28].mxu0 }
 0x31d   :  { %v1731_v1 = vpop.f32.mrb[29].mxu0  ;;  %v1217_v61 = vadd.f32 %v2140_v57, %v1216_v34 }
 0x31e   :  { %1897 = vtanh.f32 %v1075_v28  ;;  %v1219_v22 = vpop.f32.mrb[30].mxu0 }
 0x31f   :  { %v1732_v3 = vpop.f32.mrb[31].mxu0  ;;  %v1220_v14 = vadd.f32 %v2140_v57, %v1219_v22 }
 0x326   :  { %v1896_v33 = vpop.eup %1895 }
 0x327   :  { %v1080_v12 = vmul.f32 %v1896_v33, %v1078_v11 }
 0x328   :  { %v1898_v37 = vpop.eup %1897 }
 0x329   :  { %v1081_v39 = vmul.f32 %v1898_v37, %v1079_v36  ;;  %v2288_v40 = vadd.f32 %v1082_v35, %v1080_v12 }
 0x32b   :  { %v2290_v32 = vadd.f32 %v1083_v38, %v1081_v39  ;;  %1476 = vst.msk [vmem:[%s2336_s6 + $0x20] sm:$0xff] %vm89_vm1, %v2288_v40 }
 0x32d   :  { %1477 = vst.msk [vmem:[%s2336_s6 + $0x28] sm:$0xff] %vm89_vm1, %v2290_v32  ;;  %v1223_v41 = vpack.c.bf16 %v2290_v32, %v2288_v40 }
 0x32f   :  { %1738 = vmatmul.mubr.msk.bf16.vlgmr.msra.gmra.mrb[24].mxu0 %vm89_vm1, %v1223_v41  ;;  %1746 = vmatmul.mubr.msk.bf16.vlgmr.msra.gmra.mrb[24].mxu1 %vm89_vm1, %v1223_v41 }
 0x330   :  { %1750 = vmatpush3.bf16.msra.mxu1 %v2057_v15  ;;  %1753 = vmatprep.mubr.msk.bf16.mxu1 %vm1920_vm0, %v1919_v0 }
 0x331   :  { %1751 = vmatprep.subr.bf16.mxu1 %v1919_v0 }
 0x334   :  { %1752 = vmatpush3.bf16.msra.mxu1 %v2065_v16 }
 0x337   :  { %1754 = vmatmul.mubr.msk.bf16.vlgmr.msra.gmra.mrb[28].mxu1 %vm89_vm1, %v1223_v41 }
 0x402   :  { %v1261_v42 = vpop.f32.mrb[24].mxu0  ;;  %v1302_v43 = vpop.f32.mrb[24].mxu1 }
 0x403   :  { %v1782_v2 = vadd.f32 %v2123_v26, %v1261_v42  ;;  %v1739_v4 = vpop.f32.mrb[25].mxu0  ;;  %v1747_v6 = vpop.f32.mrb[25].mxu1  ;;  %v1786_v16 = vadd.f32 %v2125_v30, %v1302_v43 }
 0x404   :  { %v1264_v15 = vpop.f32.mrb[26].mxu0  ;;  %v1305_v7 = vpop.f32.mrb[26].mxu1 }
 0x405   :  { %v1487_v8 = vmul.f32 -1.442695, %v1782_v2  ;;  %v1784_v9 = vadd.f32 %v2123_v26, %v1264_v15  ;;  %v1740_v0 = vpop.f32.mrb[27].mxu0  ;;  %v1748_v44 = vpop.f32.mrb[27].mxu1  ;;  %v1788_v46 = vadd.f32 %v2125_v30, %v1305_v7  ;;  %v1489_v47 = vmul.f32 -1.442695, %v1786_v16 }
 0x407   :  { %1899 = vpow2.f32 %v1487_v8  ;;  %v1488_v45 = vmul.f32 -1.442695, %v1784_v9  ;;  %v1490_v49 = vmul.f32 -1.442695, %v1788_v46 }
 0x409   :  { %1901 = vpow2.f32 %v1488_v45 }
 0x40a   :  { %v1343_v10 = vpop.f32.mrb[28].mxu1  ;;  %1903 = vpow2.f32 %v1489_v47 }
 0x40b   :  { %v1755_v48 = vpop.f32.mrb[29].mxu1  ;;  %1905 = vpow2.f32 %v1490_v49  ;;  %v1344_v30 = vadd.f32 %v2134_v53, %v1343_v10 }
 0x40c   :  { %v1346_v50 = vpop.f32.mrb[30].mxu1 }
 0x40d   :  { %v1756_v13 = vpop.f32.mrb[31].mxu1  ;;  %v1347_v63 = vadd.f32 %v2134_v53, %v1346_v50 }
 0x411   :  { %v1900_v51 = vpop.eup %1899 }
 0x412   :  { %v1358_v52 = vadd.f32 1.0, %v1900_v51 }
 0x413   :  { %v1902_v26 = vpop.eup %1901 }
 0x414   :  { %1907 = vrcp.f32 %v1358_v52  ;;  %v1359_v54 = vadd.f32 1.0, %v1902_v26  ;;  %v1904_v55 = vpop.eup %1903 }
 0x415   :  { %v1906_v56 = vpop.eup %1905  ;;  %v1372_v58 = vadd.f32 1.0, %v1904_v55 }
 0x416   :  { %1909 = vrcp.f32 %v1359_v54  ;;  %v1373_v59 = vadd.f32 1.0, %v1906_v56 }
 0x417   :  { %1911 = vrcp.f32 %v1372_v58 }
 0x418   :  { %1913 = vrcp.f32 %v1373_v59 }
 0x41e   :  { %v1908_v60 = vpop.eup %1907 }
 0x41f   :  { %v1378_v62 = vmul.f32 %v1908_v60, %v1344_v30 }
 0x420   :  { %v1910_v5 = vpop.eup %1909 }
 0x421   :  { %v1380_v17 = vadd.f32 %v1378_v62, %v1217_v61  ;;  %v1379_v19 = vmul.f32 %v1910_v5, %v1347_v63  ;;  %v1912_v21 = vpop.eup %1911 }
 0x422   :  { %v1914_v23 = vpop.eup %1913  ;;  %v1384_v24 = vsub.f32 1.0, %v1912_v21  ;;  %v1388_v18 = vmul.f32 %v1912_v21, %v2288_v40 }
 0x423   :  { %1915 = vtanh.f32 %v1380_v17  ;;  %v1381_v20 = vadd.f32 %v1379_v19, %v1220_v14  ;;  %v1385_v27 = vsub.f32 1.0, %v1914_v23  ;;  %v1389_v53 = vmul.f32 %v1914_v23, %v2290_v32 }
 0x425   :  { %1917 = vtanh.f32 %v1381_v20 }
 0x42d   :  { %v1916_v25 = vpop.eup %1915 }
 0x42e   :  { %v1386_v28 = vmul.f32 %v1916_v25, %v1384_v24 }
 0x42f   :  { %v1918_v29 = vpop.eup %1917 }
 0x430   :  { %v1390_v31 = vadd.f32 %v1388_v18, %v1386_v28  ;;  %v1387_v11 = vmul.f32 %v1918_v29, %v1385_v27 }
 0x432   :  { %1491 = vst.msk [vmem:[%s2336_s6 + $0x30] sm:$0xff] %vm89_vm1, %v1390_v31  ;;  %v1391_v57 = vadd.f32 %v1389_v53, %v1387_v11 }
 0x434   :  { %1492 = vst.msk [vmem:[%s2336_s6 + $0x38] sm:$0xff] %vm89_vm1, %v1391_v57 }

// kernel: _lambda_.3
= control target key start
LH: loop header
LB: loop body
LE: loop exit
PB: predicated region body
PF: predicated region fallthrough
CT: control target
= control target key end

     0   :  { %s1125_s15 = smov 0   ;;  %s1127_s16 = smov 0   ;;  %s1239_s0 = inlined_call_operand.vmem [shape: bf16[32,32], index: 0, kind: input, shape index: {}]   ;;  %s1240_s1 = inlined_call_operand.vmem [shape: bf16[21,32,32], index: 1, kind: input, shape index: {}]   ;;  %s1241_s2 = inlined_call_operand.vmem [shape: f32[32,1], index: 2, kind: input, shape index: {}]   ;;  %s1242_s3 = inlined_call_operand.vmem [shape: bf16[32,32], index: 3, kind: input, shape index: {}]   ;;  %s1243_s4 = inlined_call_operand.vmem [shape: bf16[32,32], index: 4, kind: input, shape index: {}]   ;;  %s1244_s5 = inlined_call_operand.vmem [shape: f32[1,32], index: 5, kind: input, shape index: {}]   ;;  %s1245_s6 = inlined_call_operand.vmem [shape: bf16[32,32], index: 6, kind: input, shape index: {}]   ;;  %s1246_s7 = inlined_call_operand.vmem [shape: f32[1,32], index: 7, kind: input, shape index: {}]   ;;  %s1247_s8 = inlined_call_operand.vmem [shape: f32[1,32], index: 8, kind: input, shape index: {}]   ;;  %s1248_s9 = inlined_call_operand.<no memory space> [shape: f32[1,1], index: 9, kind: input, shape index: {}]   ;;  %s1249_s10 = inlined_call_operand.vmem [shape: f32[1,1,128], index: 10, kind: output, shape index: {}]  }
   0x1   :  { %v15_v0 = vstv %s1248_s9  ;;  %s1129_s17 = smov 0  }
   0x2   :  { %16 = vst [vmem:[#allocation3] sm:$0x1] %v15_v0 }
   0x3 LB: > { %s31_s9 = sadd.s32 1, %s1060_s16  ;;  %p925_p0 = scmp.ge.s32.totalorder %s1064_s17, 1  ;;  %s1064_s17 = sphi %s1129_s17, %s22_s17   ;;  %s1060_s16 = sphi %s1127_s16, %s1251_s16   ;;  %s1056_s15 = sphi %s1125_s15, %s1250_s15  }
   0x4   : > { %p32_p1 = scmp.ge.s32.totalorder %s31_s9, 21  ;;  %p355_p2 = scmp.lt.s32.totalorder %s1064_s17, 22 }
   0x6   : > { %s1253_s9 = smov (%p32_p1, %s31_s9), 0  ;;  %p356_p3 = pnand %p925_p0, %p355_p2 }
   0x7   : > { %p412_p4 = scmp.lt.s32.totalorder (!%p356_p3), %s1056_s15, 20  ;;  %p431_p5 = scmp.eq.s32.totalorder (!%p356_p3), %s1056_s15, 0 }
   0x8   : > { %359 = sbr.rel (%p356_p3) target bundleno = 1094 (0x446), region = 60  ;;  %p928_p6 = scmp.ne.s32.totalorder (!%p356_p3), %s1056_s15, 0 }
   0xf   : > { %s413_s18 = scalar_select %p412_p4, %s1056_s15, 20 }
  0x10   : > { %434 = sbr.rel (%p928_p6) target bundleno = 243 (0xf3), region = 64  ;;  %v1016_v1 = vld [vmem:[%s1242_s3] sm:$0xff] (!%p928_p6)   ;;  %v1066_v2 = vmov (!%p928_p6), 0.0   ;;  %v1017_v3 = vld [vmem:[%s1242_s3 + $0x8] sm:$0xff] (!%p928_p6)   ;;  %vm473_vm0 = vcmask (!%p928_p6), 261120  }
  0x11   : > { %s952_s19 = sshll.u32 %s413_s18, 4  ;;  %435 = vst [vmem:[%s1249_s10] sm:$0x1] (!%p928_p6), %v1066_v2  ;;  %965 = vmatprep.subr.bf16.mxu0 (!%p928_p6), %v1016_v1  ;;  %v1018_v4 = vld [vmem:[%s1239_s0] sm:$0xff] (!%p928_p6)   ;;  %v1019_v5 = vld [vmem:[%s1239_s0 + $0x8] sm:$0xff] (!%p928_p6)  }
  0x12   : > { %s1151_s22 = scalar_lea.vmem %s1240_s1, %s952_s19  ;;  %966 = vmatpush3.bf16.msra.mxu0 (!%p928_p6), %v1016_v1  ;;  %969 = vmatprep.mubr.msk.bf16.mxu0 (!%p928_p6), %vm473_vm0, %v1018_v4  ;;  %v929_v6 = vld [vmem:[%s1244_s5] ss:$0 sm:$0xff] (!%p928_p6) }
  0x13   : > { %967 = vmatprep.subr.bf16.mxu0 (!%p928_p6), %v1017_v3 }
  0x16   : > { %968 = vmatpush3.bf16.msra.mxu0 (!%p928_p6), %v1017_v3 }
  0x19   : > { %970 = vmatmul.mubr.msk.bf16.vlgmr.msra.gmra.mrb[0].mxu0 %vm473_vm0, %v1019_v5 }
  0xec   : > { %v971_v7 = vpop.f32.mrb[0].mxu0 }
  0xed   : > { %v523_v8 = vadd.f32 %v971_v7, %v929_v6  ;;  %v514_v9 = vpop.f32.mrb[1].mxu0 }
  0xee   : > { %v515_v10 = vadd.f32 %v929_v6, %v514_v9  ;;  %v972_v11 = vpop.f32.mrb[2].mxu0 }
  0xef   : > { %531 = vst.msk [vmem:[#allocation2 + $0x10] sm:$0xff] %vm473_vm0, %v523_v8  ;;  %v526_v12 = vadd.f32 %v972_v11, %v929_v6  ;;  %v517_v13 = vpop.f32.mrb[3].mxu0 }
  0xf0   : > { %529 = vst.msk [vmem:[#allocation2] sm:$0xff] %vm473_vm0, %v515_v10  ;;  %v518_v14 = vadd.f32 %v929_v6, %v517_v13 }
  0xf1   : > { %532 = vst.msk [vmem:[#allocation2 + $0x18] sm:$0xff] %vm473_vm0, %v526_v12 }
  0xf2   : > { %530 = vst.msk [vmem:[#allocation2 + $0x8] sm:$0xff] %vm473_vm0, %v518_v14 }
  0xf3 PF: > { %v1020_v15 = vld [vmem:[%s1243_s4] sm:$0xff]   ;;  %v1021_v16 = vld [vmem:[%s1243_s4 + $0x8] sm:$0xff]   ;;  %vm567_vm1 = vcmask 261120   ;;  %s749_s30 = scalar_select %p431_p5, 1.0, 0.0  ;;  %vm803_vm2 = vcmask 7168  }
  0xf4   : > { %973 = vmatprep.subr.bf16.mxu0 %v1020_v15  ;;  %v1022_v17 = vld [vmem:[%s1151_s22] sm:$0xff]   ;;  %v1023_v18 = vld [vmem:[%s1151_s22 + $0x8] sm:$0xff]   ;;  %s823_s23 = scalar_select %p928_p6, 1, 0 }
  0xf5   : > { %974 = vmatpush3.bf16.msra.mxu0 %v1020_v15  ;;  %977 = vmatprep.mubr.msk.bf16.mxu0 %vm567_vm1, %v1022_v17  ;;  %v1024_v19 = vld [vmem:[%s1245_s6] sm:$0xff]   ;;  %v1025_v20 = vld [vmem:[%s1245_s6 + $0x8] sm:$0xff]  }
  0xf6   : > { %975 = vmatprep.subr.bf16.mxu0 %v1021_v16  ;;  %981 = vmatprep.subr.bf16.mxu1 %v1024_v19  ;;  %v539_v21 = vld [vmem:[#allocation2 + $0x10] sm:$0xff]  ;;  %v942_v39 = vld [vmem:[%s1246_s7] ss:$0 sm:$0xff] }
  0xf7   : > { %982 = vmatpush3.bf16.msra.mxu1 %v1024_v19  ;;  %v537_v22 = vld [vmem:[#allocation2] sm:$0xff] }
  0xf8   : > { %983 = vmatprep.subr.bf16.mxu1 %v1025_v20  ;;  %v540_v24 = vld [vmem:[#allocation2 + $0x18] sm:$0xff]  ;;  %v947_v45 = vld [vmem:[%s1247_s8] ss:$0 sm:$0xff] }
  0xf9   : > { %976 = vmatpush3.bf16.msra.mxu0 %v1021_v16  ;;  %v538_v27 = vld [vmem:[#allocation2 + $0x8] sm:$0xff]  ;;  %v948_v61 = vld [vmem:[#allocation3] ss:$0 sm:$0xff] }
  0xfb   : > { %984 = vmatpush3.bf16.msra.mxu1 %v1025_v20 }
  0xfc   : > { %978 = vmatmul.mubr.msk.bf16.vlgmr.msra.gmra.mrb[0].mxu0 %vm567_vm1, %v1023_v18 }
 0x1cf   : > { %v979_v23 = vpop.f32.mrb[0].mxu0 }
 0x1d0   : > { %v625_v25 = vadd.f32 %v979_v23, %v539_v21  ;;  %v608_v26 = vpop.f32.mrb[1].mxu0 }
 0x1d1   : > { %v623_v28 = vadd.f32 %v608_v26, %v537_v22  ;;  %v980_v29 = vpop.f32.mrb[2].mxu0  ;;  %v754_v26 = vstv %s749_s30 }
 0x1d2   : > { %v626_v30 = vadd.f32 %v980_v29, %v540_v24  ;;  %v611_v31 = vpop.f32.mrb[3].mxu0  ;;  %v629_v33 = vmax.f32 %v625_v25, 0.0 }
 0x1d3   : > { %v624_v32 = vadd.f32 %v611_v31, %v538_v27  ;;  %v627_v35 = vmax.f32 %v623_v28, 0.0 }
 0x1d4   : > { %v630_v34 = vmax.f32 %v626_v30, 0.0 }
 0x1d5   : > { %v628_v36 = vmax.f32 %v624_v32, 0.0 }
 0x1d6   : > { %v632_v37 = vpack.c.bf16 %v630_v34, %v629_v33 }
 0x1d7   : > { %v631_v38 = vpack.c.bf16 %v628_v36, %v627_v35 }
 0x1d9   : > { %985 = vmatprep.mubr.msk.bf16.mxu1 %vm567_vm1, %v631_v38 }
 0x1da   : > { %986 = vmatmul.mubr.msk.bf16.vlgmr.msra.gmra.mrb[0].mxu1 %vm567_vm1, %v632_v37 }
 0x2ad   : > { %v987_v40 = vpop.f32.mrb[0].mxu1 }
 0x2ae   : > { %v705_v41 = vadd.f32 %v987_v40, %v942_v39  ;;  %v696_v42 = vpop.f32.mrb[1].mxu1 }
 0x2af   : > { %v697_v43 = vadd.f32 %v942_v39, %v696_v42  ;;  %v988_v44 = vpop.f32.mrb[2].mxu1 }
 0x2b0   : > { %v713_v46 = vmax.f32 %v705_v41, 0.0  ;;  %v708_v47 = vadd.f32 %v988_v44, %v942_v39  ;;  %v699_v48 = vpop.f32.mrb[3].mxu1 }
 0x2b1   : > { %v711_v49 = vmax.f32 %v697_v43, 0.0  ;;  %v700_v50 = vadd.f32 %v942_v39, %v699_v48 }
 0x2b2   : > { %v714_v51 = vmax.f32 %v708_v47, 0.0  ;;  %v724_v52 = vmul.f32 %v947_v45, %v713_v46 }
 0x2b3   : > { %v712_v53 = vmax.f32 %v700_v50, 0.0  ;;  %v722_v54 = vmul.f32 %v947_v45, %v711_v49  ;;  %v796_v50 = vld [vmem:[%s1241_s2 + $0x8] sm:$0xff] }
 0x2b4   : > { %v732_v55 = vsel %vm567_vm1, %v724_v52, 0.0  ;;  %v725_v56 = vmul.f32 %v947_v45, %v714_v51  ;;  %v797_v51 = vld [vmem:[%s1241_s2 + $0x10] sm:$0xff] }
 0x2b5   : > { %733 = vadd.xlane.f32.xlu1 %v732_v55  ;;  %v726_v57 = vsel %vm567_vm1, %v722_v54, 0.0  ;;  %v723_v58 = vmul.f32 %v947_v45, %v712_v53  ;;  %v795_v45 = vld [vmem:[%s1241_s2] sm:$0xff]  ;;  %v798_v55 = vld [vmem:[%s1241_s2 + $0x18] sm:$0xff] }
 0x2b6   : > { %727 = vadd.xlane.f32.xlu0 %v726_v57  ;;  %v735_v59 = vsel %vm567_vm1, %v725_v56, 0.0 }
 0x2b7   : > { %v729_v60 = vsel %vm567_vm1, %v723_v58, 0.0 }
 0x2b9   : > { %736 = vadd.xlane.f32.xlu1 %v735_v59 }
 0x2ba   : > { %730 = vadd.xlane.f32.xlu0 %v729_v60 }
 0x342   : > { %v734_v62 = vpop.xlane.xlu1 %733 }
 0x343   : > { %v747_v63 = vadd.f32 %v948_v61, %v734_v62  ;;  %v728_v0 = vpop.xlane.xlu0 %727 }
 0x344   : > { %v745_v1 = vadd.f32 %v948_v61, %v728_v0 }
 0x345   : > { %v765_v2 = vand.u32 2147483647, %v747_v63  ;;  %v752_v30 = vmax.f32 %v747_v63, 0.0  ;;  %v757_v31 = vmul.f32 %v754_v26, %v747_v63 }
 0x346   : > { %v763_v3 = vand.u32 2147483647, %v745_v1  ;;  %v737_v4 = vpop.xlane.xlu1 %736  ;;  %v750_v27 = vmax.f32 %v745_v1, 0.0  ;;  %v755_v28 = vmul.f32 %v754_v26, %v745_v1 }
 0x347   : > { %v769_v5 = vsub.f32 0.0, %v765_v2  ;;  %v748_v6 = vadd.f32 %v948_v61, %v737_v4  ;;  %v731_v7 = vpop.xlane.xlu0 %730  ;;  %v761_v41 = vsub.f32 %v752_v30, %v757_v31 }
 0x348   : > { %v767_v8 = vsub.f32 0.0, %v763_v3  ;;  %v746_v9 = vadd.f32 %v948_v61, %v731_v7  ;;  %v759_v33 = vsub.f32 %v750_v27, %v755_v28 }
 0x349   : > { %v775_v10 = vmul.f32 1.442695, %v769_v5  ;;  %v766_v11 = vand.u32 2147483647, %v748_v6  ;;  %v753_v34 = vmax.f32 %v748_v6, 0.0  ;;  %v758_v35 = vmul.f32 %v754_v26, %v748_v6 }
 0x34a   : > { %v771_v12 = vmul.f32 1.442695, %v767_v8  ;;  %v764_v13 = vand.u32 2147483647, %v746_v9  ;;  %v751_v37 = vmax.f32 %v746_v9, 0.0  ;;  %v756_v38 = vmul.f32 %v754_v26, %v746_v9 }
 0x34b   : > { %1026 = vpow2.f32 %v775_v10  ;;  %v770_v14 = vsub.f32 0.0, %v766_v11  ;;  %v762_v46 = vsub.f32 %v753_v34, %v758_v35  ;;  %v820_v9 = vlaneseq }
 0x34c   : > { %1028 = vpow2.f32 %v771_v12  ;;  %v768_v15 = vsub.f32 0.0, %v764_v13  ;;  %v760_v47 = vsub.f32 %v751_v37, %v756_v38  ;;  %v825_v11 = vstv %s823_s23  ;;  %v824_v12 = vld [vmem:[%s1249_s10] sm:$0x1] }
 0x34d   : > { %v777_v16 = vmul.f32 1.442695, %v770_v14  ;;  %v821_v10 = vand.u32 127, %v820_v9 }
 0x34e   : > { %v773_v17 = vmul.f32 1.442695, %v768_v15 }
 0x34f   : > { %1030 = vpow2.f32 %v777_v16  ;;  %vm826_vm3 = vcmp.eq.s32.totalorder %v821_v10, %v825_v11 }
 0x350   : > { %1032 = vpow2.f32 %v773_v17 }
 0x355   : > { %v1027_v18 = vpop.eup %1026 }
 0x356   : > { %v1029_v19 = vpop.eup %1028  ;;  %v781_v20 = vadd.f32 1.0, %v1027_v18 }
 0x357   : > { %v779_v21 = vadd.f32 1.0, %v1029_v19 }
 0x358   : > { %1034 = vlog2.f32 %v781_v20 }
 0x359   : > { %v1031_v22 = vpop.eup %1030  ;;  %1036 = vlog2.f32 %v779_v21 }
 0x35a   : > { %v1033_v23 = vpop.eup %1032  ;;  %v782_v24 = vadd.f32 1.0, %v1031_v22 }
 0x35b   : > { %v780_v25 = vadd.f32 1.0, %v1033_v23 }
 0x35c   : > { %1038 = vlog2.f32 %v782_v24 }
 0x35d   : > { %1040 = vlog2.f32 %v780_v25 }
 0x362   : > { %v1035_v29 = vpop.eup %1034 }
 0x363   : > { %v1037_v32 = vpop.eup %1036  ;;  %v788_v39 = vmul.f32 0.6931472, %v1035_v29 }
 0x364   : > { %v784_v36 = vmul.f32 0.6931472, %v1037_v32 }
 0x365   : > { %v793_v49 = vadd.f32 %v788_v39, %v761_v41 }
 0x366   : > { %v1039_v40 = vpop.eup %1038  ;;  %v791_v42 = vadd.f32 %v784_v36, %v759_v33 }
 0x367   : > { %v1041_v43 = vpop.eup %1040  ;;  %v790_v44 = vmul.f32 0.6931472, %v1039_v40  ;;  %v801_v57 = vmul.f32 %v797_v51, %v793_v49 }
 0x368   : > { %v786_v48 = vmul.f32 0.6931472, %v1041_v43  ;;  %v799_v54 = vmul.f32 %v795_v45, %v791_v42 }
 0x369   : > { %v794_v53 = vadd.f32 %v790_v44, %v762_v46  ;;  %v807_v62 = vsel %vm803_vm2, %v801_v57, 0.0 }
 0x36a   : > { %v792_v52 = vadd.f32 %v786_v48, %v760_v47  ;;  %v804_v59 = vsel %vm803_vm2, %v799_v54, 0.0 }
 0x36b   : > { %v802_v58 = vmul.f32 %v798_v55, %v794_v53 }
 0x36c   : > { %v800_v56 = vmul.f32 %v796_v50, %v792_v52 }
 0x36d   : > { %v809_v0 = vsel %vm803_vm2, %v802_v58, 0.0 }
 0x36e   : > { %v805_v60 = vsel %vm803_vm2, %v800_v56, 0.0 }
 0x36f   : > { %v806_v61 = vadd.f32 %v805_v60, %v804_v59 }
 0x371   : > { %v808_v63 = vadd.f32 %v807_v62, %v806_v61 }
 0x373   : > { %v810_v1 = vadd.f32 %v809_v0, %v808_v63 }
 0x375   : > { %811 = vadd.xlane.f32.xlu0 %v810_v1 }
 0x402   : > { %v812_v2 = vpop.xlane.xlu0 %811 }
 0x403   : > { %v813_v3 = vrot.slane %v812_v2, 4 }
 0x405   : > { %v814_v4 = vadd.f32 %v813_v3, %v812_v2 }
 0x407   : > { %v815_v5 = vrot.slane %v814_v4, 2 }
 0x409   : > { %v816_v6 = vadd.f32 %v815_v5, %v814_v4 }
 0x40b   : > { %v817_v7 = vrot.slane %v816_v6, 1 }
 0x40d   : > { %v818_v8 = vadd.f32 %v817_v7, %v816_v6 }
 0x40f   : > { %989 = vpush %v818_v8 }
 0x440   : > { %s990_s24 = spop %989 }
 0x441   : > { %v827_v13 = vstv %s990_s24 }
 0x442   : > { %v828_v14 = vsel %vm826_vm3, %v827_v13, 0.0 }
 0x443   : > { %v829_v15 = vadd.f32 %v828_v14, %v824_v12 }
 0x445   : > { %830 = vst [vmem:[%s1249_s10] sm:$0x1] %v829_v15 }
 0x446 PF: > { %s22_s17 = sadd.s32 1, %s1064_s17   ;;  %s1250_s15 = smov %s1060_s16 }
 0x447   : > { %p19_p7 = scmp.ge.s32.totalorder %s22_s17, 23   ;;  %s1251_s16 = smov %s1253_s9 }
 0x449   :  { %21 = sbr.rel (!%p19_p7) target bundleno = 3 (0x3), region = 100 }

</bundles_post_ra>
